<compile_context>
chip_gen: v7x
topology: tpu7x:2x2x1
jax: 0.10.0
libtpu: 0.0.40
codegen_flags: <defaults>
</compile_context>

<pallas_src>
import math

import jax
import jax.numpy as jnp
from jax import lax
from jax.experimental import pallas as pl
from jax.experimental.pallas import tpu as pltpu


# ----------------------------------------------------------------------------
# small in-kernel helpers
# ----------------------------------------------------------------------------
def _gelu(x):
    # tanh-approximate GELU: routes the transcendental to the EUP slot.
    # (Small deviation from torch.nn.GELU's default exact-erf formulation.)
    c = math.sqrt(2.0 / math.pi)
    return 0.5 * x * (1.0 + jnp.tanh(c * (x + 0.044715 * (x * x * x))))


def _softmax_last(s):
    m = jnp.max(s, axis=-1, keepdims=True)
    e = jnp.exp(s - m)
    return e * pl.reciprocal(jnp.sum(e, axis=-1, keepdims=True), approx=True)


def _bf16(x):
    return x.astype(jnp.bfloat16)


def _mm(a, b):
    # bf16 MXU matmul, f32 accumulation
    return jnp.dot(_bf16(a), _bf16(b), preferred_element_type=jnp.float32)


def _mm_nt(a, b):
    # a @ b.T with the transpose folded into the MXU operand (no XLU copy)
    return lax.dot_general(_bf16(a), _bf16(b),
                           dimension_numbers=(((1,), (1,)), ((), ())),
                           preferred_element_type=jnp.float32)


# ----------------------------------------------------------------------------
# Pallas kernel 1: minimal two-way cross-attention "transformer".
# Grid (B0, nc); image-side projections computed once per image (ci == 0) and
# held in bf16 VMEM scratch for all nc class steps.
# ----------------------------------------------------------------------------
def _twoway_attn_kernel(tok_ref, src_ref, pos_ref,
                        wq1, wk1, wv1, wo1, wq2, wk2, wv2, wo2,
                        hs_ref, src_out_ref,
                        k_scr, v_scr, q2_scr):
    ci = pl.program_id(1)
    d = tok_ref.shape[-1]
    scale = 1.0 / math.sqrt(d)

    @pl.when(ci == 0)
    def _():
        # class-independent, S-scale work: 3 of the 4 SxDxD matmuls + src+pos add
        src = src_ref[0].astype(jnp.float32)                      # (S, D)
        kin = src + pos_ref[0].astype(jnp.float32)
        k_scr[...] = _mm(kin, wk1[...]).astype(jnp.bfloat16)
        v_scr[...] = _mm(src, wv1[...]).astype(jnp.bfloat16)
        q2_scr[...] = _mm(kin, wq2[...]).astype(jnp.bfloat16)

    tok = tok_ref[0]                                              # (T, D) f32

    # tokens attend to image
    q = _mm(tok, wq1[...])
    a = _softmax_last(_mm_nt(q, k_scr[...]) * scale)
    tok2 = tok + _mm(_mm(a, v_scr[...]), wo1[...])

    # image attends to tokens
    k2 = _mm(tok2, wk2[...])
    v2 = _mm(tok2, wv2[...])
    a2 = _softmax_last(_mm_nt(q2_scr[...], k2) * scale)
    src2 = src_ref[0].astype(jnp.float32) + _mm(_mm(a2, v2), wo2[...])

    hs_ref[0] = tok2.astype(hs_ref.dtype)
    src_out_ref[0] = src2.astype(src_out_ref.dtype)               # bf16


def transformer_pallas(tokens, src_base, pos_base, tw, B0, nc):
    b, t, d = tokens.shape
    s = src_base.shape[1]
    wspec = pl.BlockSpec((d, d), lambda bi, ci: (0, 0))
    return pl.pallas_call(
        _twoway_attn_kernel,
        out_shape=(jax.ShapeDtypeStruct((b, t, d), jnp.float32),
                   jax.ShapeDtypeStruct((b, s, d), jnp.bfloat16)),
        grid=(B0, nc),
        in_specs=[pl.BlockSpec((1, t, d), lambda bi, ci: (bi * nc + ci, 0, 0)),
                  # image embedding / PE: per-image block, never replicated in HBM
                  pl.BlockSpec((1, s, d), lambda bi, ci: (bi, 0, 0)),
                  pl.BlockSpec((1, s, d), lambda bi, ci: (0, 0, 0))] + [wspec] * 8,
        out_specs=(pl.BlockSpec((1, t, d), lambda bi, ci: (bi * nc + ci, 0, 0)),
                   pl.BlockSpec((1, s, d), lambda bi, ci: (bi * nc + ci, 0, 0))),
        scratch_shapes=[pltpu.VMEM((s, d), jnp.bfloat16)] * 3,     # k, v, q2
        compiler_params=pltpu.CompilerParams(
            # nc must be "arbitrary" (scratch carried across it); B0 stays parallel
            dimension_semantics=("parallel", "arbitrary"),
            vmem_limit_bytes=32 * 1024 * 1024),
    )(tokens, src_base, pos_base, *tw)


# ----------------------------------------------------------------------------
# Pallas kernel 2 (fused token heads): all num_mask_tokens hypernetwork MLPs +
# the IoU prediction MLP in a single pallas_call (single grid step).
# ----------------------------------------------------------------------------
def _token_heads_kernel(hs_ref, hw1, hb1, hw2, hb2, hw3, hb3,
                        iw1, ib1, iw2, ib2, iw3, ib3,
                        hyper_ref, iou_ref):
    hs = hs_ref[...]                                              # (b, 1+nmt, D)

    # IoU head
    x = hs[:, 0, :]
    h = jnp.maximum(jnp.dot(x, iw1[...], preferred_element_type=jnp.float32) + ib1[...], 0.0)
    h = jnp.maximum(jnp.dot(h, iw2[...], preferred_element_type=jnp.float32) + ib2[...], 0.0)
    iou_ref[...] = (jnp.dot(h, iw3[...], preferred_element_type=jnp.float32)
                    + ib3[...]).astype(iou_ref.dtype)

    # hypernetwork MLPs (one per mask token), statically unrolled
    nmt = hyper_ref.shape[1]
    for i in range(nmt):
        xi = hs[:, 1 + i, :]
        g = jnp.maximum(jnp.dot(xi, hw1[i], preferred_element_type=jnp.float32) + hb1[i], 0.0)
        g = jnp.maximum(jnp.dot(g, hw2[i], preferred_element_type=jnp.float32) + hb2[i], 0.0)
        hyper_ref[:, i, :] = (jnp.dot(g, hw3[i], preferred_element_type=jnp.float32)
                              + hb3[i]).astype(hyper_ref.dtype)


def token_heads_pallas(hs, p):
    b = hs.shape[0]
    nmt = p["num_mask_tokens"]
    c2 = p["hyper_w3"].shape[-1]
    return pl.pallas_call(
        _token_heads_kernel,
        out_shape=(jax.ShapeDtypeStruct((b, nmt, c2), jnp.float32),
                   jax.ShapeDtypeStruct((b, nmt), jnp.float32)),
    )(hs, p["hyper_w1"], p["hyper_b1"], p["hyper_w2"], p["hyper_b2"],
      p["hyper_w3"], p["hyper_b3"],
      p["iou_w1"], p["iou_b1"], p["iou_w2"], p["iou_b2"], p["iou_w3"], p["iou_b3"])


# ----------------------------------------------------------------------------
# Pallas kernel 3 (fused): ConvT2x2s2 -> LayerNorm2d -> GELU -> ConvT2x2s2 ->
# GELU -> hyper_in @ upscaled, all in VMEM; only the (small) masks hit HBM.
# Stage-1/stage-2 ConvT weights are concatenated ((C,4*c1) / (c1,4*c2)) so each
# stage is ONE wide MXU matmul; the mask product uses a block-diagonal hyper
# operand so every store is a sublane-dense (4*nmt)-row unmasked store.
# ----------------------------------------------------------------------------
def _upscale_mask_kernel(src_ref, hyp_ref, w1_ref, b1_ref, g_ref, bb_ref,
                         w2_ref, b2_ref, o_ref):
    c1 = g_ref.shape[-1]
    nmt4 = hyp_ref.shape[1]                                       # 4 * nmt

    src = src_ref[0]                                              # (S, C) bf16
    hyp = hyp_ref[0]                                              # (4*nmt, 4*c2) bf16

    # stage 1: all four sub-pixels of the first ConvT in one wide MXU matmul
    y_all = jnp.dot(src, w1_ref[...], preferred_element_type=jnp.float32) + b1_ref[...]

    for kk in range(4):                                           # sub-pixel (ki, kj)
        y = y_all[:, kk * c1:(kk + 1) * c1]
        # LayerNorm2d: per output pixel over channels (f32), then GELU
        u = jnp.mean(y, axis=-1, keepdims=True)
        dlt = y - u
        var = jnp.mean(dlt * dlt, axis=-1, keepdims=True)
        ya = _gelu(dlt * lax.rsqrt(var + 1e-6) * g_ref[...] + bb_ref[...])
        # stage 2: all four sub-pixels of the second ConvT in one matmul
        z = _gelu(jnp.dot(ya.astype(jnp.bfloat16), w2_ref[...],
                          preferred_element_type=jnp.float32) + b2_ref[...])   # (S, 4*c2)
        # masks: block-diagonal hyper (4*nmt, 4*c2) @ z.T -> (4*nmt, S)
        m = lax.dot_general(hyp, z.astype(jnp.bfloat16),
                            dimension_numbers=(((1,), (1,)), ((), ())),
                            preferred_element_type=jnp.float32)
        o_ref[0, kk * nmt4:(kk + 1) * nmt4, :] = m.astype(o_ref.dtype)


def upscale_mask_pallas(src_out, hyper_bd, w1cat, b1cat, ln_g, ln_b, w2cat, b2cat):
    b, s, c = src_out.shape
    nmt4, c24 = hyper_bd.shape[1], hyper_bd.shape[2]
    return pl.pallas_call(
        _upscale_mask_kernel,
        out_shape=jax.ShapeDtypeStruct((b, 4 * nmt4, s), jnp.bfloat16),
        grid=(b,),
        in_specs=[pl.BlockSpec((1, s, c), lambda i: (i, 0, 0)),
                  pl.BlockSpec((1, nmt4, c24), lambda i: (i, 0, 0)),
                  pl.BlockSpec(w1cat.shape, lambda i: (0, 0)),
                  pl.BlockSpec(b1cat.shape, lambda i: (0, 0)),
                  pl.BlockSpec(ln_g.shape, lambda i: (0, 0)),
                  pl.BlockSpec(ln_b.shape, lambda i: (0, 0)),
                  pl.BlockSpec(w2cat.shape, lambda i: (0, 0)),
                  pl.BlockSpec(b2cat.shape, lambda i: (0, 0))],
        out_specs=pl.BlockSpec((1, 4 * nmt4, s), lambda i: (i, 0, 0)),
        compiler_params=pltpu.CompilerParams(
            dimension_semantics=("parallel",),
            vmem_limit_bytes=32 * 1024 * 1024),
    )(src_out, hyper_bd, w1cat, b1cat, ln_g, ln_b, w2cat, b2cat)


# ----------------------------------------------------------------------------
# MaskDecoder forward (predict_masks_1 path)
# ----------------------------------------------------------------------------
def predict_masks_1(p, image_embeddings, image_pe):
    D = p["dim"]
    nc = p["num_classes"]
    nmt = p["num_mask_tokens"]
    B0 = image_embeddings.shape[0]
    C, H, W = image_embeddings.shape[2:]
    S = H * W
    b = B0 * nc

    # --- tokens (tiny, pure JAX) ---
    mask_tokens = p["mask_tokens_w"].reshape(nc, nmt, D)
    output_tokens = jnp.concatenate([p["iou_token_w"][:, None, :], mask_tokens], axis=1)
    tokens = jnp.tile(output_tokens, (B0, 1, 1))                    # (b, 1+nmt, D)

    # --- channels-last image embedding / PE in bf16; NO nc-fold broadcast in HBM ---
    src_base = image_embeddings[:, 0].reshape(B0, C, S).transpose(0, 2, 1).astype(jnp.bfloat16)
    pos_base = image_pe.reshape(1, C, S).transpose(0, 2, 1).astype(jnp.bfloat16)

    hs, src_out = transformer_pallas(tokens, src_base, pos_base,
                                     p["transformer_w"], B0, nc)    # f32 / bf16

    # --- fused hypernetwork + iou heads: one pallas_call, no grid ---
    hyper_in, iou_pred = token_heads_pallas(hs, p)                  # (b,nmt,c2), (b,nmt)

    # block-diagonal hyper operand: row j*nmt+t holds hyper[:,t,:] in cols j*c2:(j+1)*c2
    c2 = hyper_in.shape[-1]
    eye4 = jnp.eye(4, dtype=hyper_in.dtype)
    hyper_bd = jnp.einsum("jk,btc->bjtkc", eye4, hyper_in)
    hyper_bd = hyper_bd.reshape(b, 4 * nmt, 4 * c2).astype(jnp.bfloat16)

    # --- fused upscaling + mask product; `upscaled` never written to HBM ---
    masks_blk = upscale_mask_pallas(src_out, hyper_bd,
                                    p["up_w1cat"], p["up_b1cat"],
                                    p["ln_g"], p["ln_b"],
                                    p["up_w2cat"], p["up_b2cat"])   # (b, 16*nmt, S) bf16

    # un-shuffle the 2x2 x 2x2 sub-pixel lattice (small masks tensor only, bf16)
    # row = ((ki*2+kj)*2+ki2)*2+kj2)*nmt + t; output pixel (4h+2ki+ki2, 4w+2kj+kj2)
    masks = masks_blk.reshape(b, 2, 2, 2, 2, nmt, H, W)
    masks = masks.transpose(0, 5, 6, 1, 3, 7, 2, 4).reshape(b, nmt, 4 * H, 4 * W)
    masks = masks.astype(jnp.float32)
    return masks, iou_pred


def mask_decoder_forward(p, image_embeddings, image_pe, multimask_output=False):
    masks, iou_pred = predict_masks_1(p, image_embeddings, image_pe)
    if multimask_output:
        masks = masks[:, 1:, :, :]
        iou_pred = iou_pred[:, 1:]
    else:
        masks = masks[:, 0:1, :, :]
        iou_pred = iou_pred[:, 0:1]
    return masks, iou_pred


# ----------------------------------------------------------------------------
# deterministic parameter initialization (synthetic, not a checkpoint)
# ----------------------------------------------------------------------------
def pack_params(p):
    D = p["dim"]
    c1, c2 = D // 4, D // 8
    # ConvTranspose2d(k=2,s=2) weights split per output sub-pixel:
    #   w1s[ki*2+kj, ic, oc] = W1[ic, oc, ki, kj]   (torch layout Cin,Cout,kH,kW)
    w1s = p["up_w1"].transpose(2, 3, 0, 1).reshape(4, D, c1)
    w2s = p["up_w2"].transpose(2, 3, 0, 1).reshape(4, c1, c2)
    # concatenated (lane-wide) per-stage weights for single MXU matmuls
    p["up_w1cat"] = w1s.transpose(1, 0, 2).reshape(D, 4 * c1).astype(jnp.bfloat16)
    p["up_w2cat"] = w2s.transpose(1, 0, 2).reshape(c1, 4 * c2).astype(jnp.bfloat16)
    p["up_b1cat"] = jnp.tile(p["up_b1_raw"].reshape(1, c1), (1, 4))
    p["up_b2cat"] = jnp.tile(p["up_b2_raw"].reshape(1, c2), (1, 4))
    p["ln_g"] = p["ln_g_raw"].reshape(1, c1)
    p["ln_b"] = p["ln_b_raw"].reshape(1, c1)
    # stack per-mask-token hypernet MLPs: (nmt, in, out) / (nmt, 1, out)
    p["hyper_w1"] = jnp.stack([l[0][0] for l in p["hyper_mlps"]])
    p["hyper_b1"] = jnp.stack([l[0][1].reshape(1, -1) for l in p["hyper_mlps"]])
    p["hyper_w2"] = jnp.stack([l[1][0] for l in p["hyper_mlps"]])
    p["hyper_b2"] = jnp.stack([l[1][1].reshape(1, -1) for l in p["hyper_mlps"]])
    p["hyper_w3"] = jnp.stack([l[2][0] for l in p["hyper_mlps"]])
    p["hyper_b3"] = jnp.stack([l[2][1].reshape(1, -1) for l in p["hyper_mlps"]])
    (w1, b1), (w2, b2), (w3, b3) = p["iou_mlp_raw"]
    p["iou_w1"], p["iou_b1"] = w1, b1.reshape(1, -1)
    p["iou_w2"], p["iou_b2"] = w2, b2.reshape(1, -1)
    p["iou_w3"], p["iou_b3"] = w3, b3.reshape(1, -1)
    return p


def init_params(seed, D, num_classes, num_multimask_outputs, iou_hidden, iou_depth=3):
    nmt = num_multimask_outputs + 1
    keys = iter(jax.random.split(jax.random.PRNGKey(seed), 128))

    def nrm(shape, scale=0.05):
        return (scale * jax.random.normal(next(keys), shape)).astype(jnp.float32)

    p = dict(dim=D, num_classes=num_classes, num_mask_tokens=nmt)
    p["iou_token_w"] = nrm((num_classes, D))
    p["mask_tokens_w"] = nrm((num_classes * nmt, D))
    p["transformer_w"] = tuple(nrm((D, D)) for _ in range(8))
    p["up_w1"] = nrm((D, D // 4, 2, 2))            # torch ConvTranspose2d layout
    p["up_b1_raw"] = nrm((D // 4,))
    p["ln_g_raw"] = jnp.ones((D // 4,), jnp.float32)
    p["ln_b_raw"] = jnp.zeros((D // 4,), jnp.float32)
    p["up_w2"] = nrm((D // 4, D // 8, 2, 2))
    p["up_b2_raw"] = nrm((D // 8,))
    p["hyper_mlps"] = [
        [(nrm((D, D)), nrm((D,))),
         (nrm((D, D)), nrm((D,))),
         (nrm((D, D // 8)), nrm((D // 8,)))]
        for _ in range(nmt)
    ]
    dims = [D] + [iou_hidden] * (iou_depth - 1) + [nmt]
    p["iou_mlp_raw"] = [(nrm((dims[i], dims[i + 1])), nrm((dims[i + 1],)))
                        for i in range(iou_depth)]
    return pack_params(p)


# ----------------------------------------------------------------------------
if __name__ == "__main__":
    B0, D, H, W = 2, 32, 8, 8          # transformer_dim=32, image grid 8x8
    num_classes, num_multimask = 4, 3

    key = jax.random.PRNGKey(0)
    k1, k2 = jax.random.split(key)
    image_embeddings = jax.random.normal(k1, (B0, 1, D, H, W), dtype=jnp.float32)
    image_pe = jax.random.normal(k2, (1, D, H, W), dtype=jnp.float32)

    params = init_params(seed=1, D=D, num_classes=num_classes,
                         num_multimask_outputs=num_multimask, iou_hidden=64)

    masks, iou_pred = mask_decoder_forward(params, image_embeddings, image_pe,
                                           multimask_output=False)
    jax.block_until_ready((masks, iou_pred))

    assert masks.shape == (B0 * num_classes, 1, 4 * H, 4 * W), masks.shape
    assert iou_pred.shape == (B0 * num_classes, 1), iou_pred.shape
    print("KERNEL_OK")
</pallas_src>

<mosaic_0001>
module attributes {stable_mosaic.version = 11 : i64} {
  func.func @_twoway_attn_kernel(%arg0: i32, %arg1: i32, %arg2: memref<1x5x32xf32, #tpu.memory_space<vmem>>, %arg3: memref<1x64x32xbf16, #tpu.memory_space<vmem>>, %arg4: memref<1x64x32xbf16, #tpu.memory_space<vmem>>, %arg5: memref<32x32xf32, #tpu.memory_space<vmem>>, %arg6: memref<32x32xf32, #tpu.memory_space<vmem>>, %arg7: memref<32x32xf32, #tpu.memory_space<vmem>>, %arg8: memref<32x32xf32, #tpu.memory_space<vmem>>, %arg9: memref<32x32xf32, #tpu.memory_space<vmem>>, %arg10: memref<32x32xf32, #tpu.memory_space<vmem>>, %arg11: memref<32x32xf32, #tpu.memory_space<vmem>>, %arg12: memref<32x32xf32, #tpu.memory_space<vmem>>, %arg13: memref<1x5x32xf32, #tpu.memory_space<vmem>>, %arg14: memref<1x64x32xbf16, #tpu.memory_space<vmem>>, %arg15: memref<64x32xbf16, #tpu.memory_space<vmem>>, %arg16: memref<64x32xbf16, #tpu.memory_space<vmem>>, %arg17: memref<64x32xbf16, #tpu.memory_space<vmem>>) attributes {dimension_semantics = [#tpu.dimension_semantics<parallel>, #tpu.dimension_semantics<arbitrary>], iteration_bounds = array<i64: 2, 4>, scalar_prefetch = 0 : i64, scratch_operands = 3 : i64, tpu.core_type = #tpu.core_type<tc>, window_params = [{transform_indices = @transform_0, window_bounds = array<i64: 1, 5, 32>}, {transform_indices = @transform_1, window_bounds = array<i64: 1, 64, 32>}, {pipeline_mode = #tpu.pipeline_mode<synchronous>, transform_indices = @transform_2, window_bounds = array<i64: 1, 64, 32>}, {pipeline_mode = #tpu.pipeline_mode<synchronous>, transform_indices = @transform_3, window_bounds = array<i64: 32, 32>}, {pipeline_mode = #tpu.pipeline_mode<synchronous>, transform_indices = @transform_4, window_bounds = array<i64: 32, 32>}, {pipeline_mode = #tpu.pipeline_mode<synchronous>, transform_indices = @transform_5, window_bounds = array<i64: 32, 32>}, {pipeline_mode = #tpu.pipeline_mode<synchronous>, transform_indices = @transform_6, window_bounds = array<i64: 32, 32>}, {pipeline_mode = #tpu.pipeline_mode<synchronous>, transform_indices = @transform_7, window_bounds = array<i64: 32, 32>}, {pipeline_mode = #tpu.pipeline_mode<synchronous>, transform_indices = @transform_8, window_bounds = array<i64: 32, 32>}, {pipeline_mode = #tpu.pipeline_mode<synchronous>, transform_indices = @transform_9, window_bounds = array<i64: 32, 32>}, {pipeline_mode = #tpu.pipeline_mode<synchronous>, transform_indices = @transform_10, window_bounds = array<i64: 32, 32>}, {transform_indices = @transform_11, window_bounds = array<i64: 1, 5, 32>}, {transform_indices = @transform_12, window_bounds = array<i64: 1, 64, 32>}]} {
    %c0_i32 = arith.constant 0 : i32
    %0 = arith.cmpi eq, %arg1, %c0_i32 : i32
    %1 = arith.extui %0 : i1 to i32
    %c0_i32_0 = arith.constant 0 : i32
    %2 = arith.cmpi ne, %1, %c0_i32_0 : i32
    scf.if %2 {
      %c0_42 = arith.constant 0 : index
      %c0_43 = arith.constant 0 : index
      %c0_44 = arith.constant 0 : index
      %73 = vector.load %arg3[%c0_42, %c0_43, %c0_44] : memref<1x64x32xbf16, #tpu.memory_space<vmem>>, vector<1x64x32xbf16>
      %74 = vector.shape_cast %73 : vector<1x64x32xbf16> to vector<64x32xbf16>
      %75 = arith.extf %74 : vector<64x32xbf16> to vector<64x32xf32>
      %c0_45 = arith.constant 0 : index
      %c0_46 = arith.constant 0 : index
      %c0_47 = arith.constant 0 : index
      %76 = vector.load %arg4[%c0_45, %c0_46, %c0_47] : memref<1x64x32xbf16, #tpu.memory_space<vmem>>, vector<1x64x32xbf16>
      %77 = vector.shape_cast %76 : vector<1x64x32xbf16> to vector<64x32xbf16>
      %78 = arith.extf %77 : vector<64x32xbf16> to vector<64x32xf32>
      %79 = arith.addf %75, %78 : vector<64x32xf32>
      %c0_48 = arith.constant 0 : index
      %c0_49 = arith.constant 0 : index
      %80 = vector.load %arg6[%c0_48, %c0_49] : memref<32x32xf32, #tpu.memory_space<vmem>>, vector<32x32xf32>
      %81 = arith.truncf %79 : vector<64x32xf32> to vector<64x32xbf16>
      %82 = arith.truncf %80 : vector<32x32xf32> to vector<32x32xbf16>
      %cst_50 = arith.constant dense<0.000000e+00> : vector<64x32xf32>
      %83 = tpu.matmul %81, %82, %cst_50 {dimension_numbers = #tpu.dot_dimension_numbers<[1], [0], [0], [1], [0, 0, 1, 1], [], []>} : vector<64x32xbf16>, vector<32x32xbf16>, vector<64x32xf32> -> vector<64x32xf32>
      %84 = arith.truncf %83 : vector<64x32xf32> to vector<64x32xbf16>
      %c0_51 = arith.constant 0 : index
      %c0_52 = arith.constant 0 : index
      %85 = vector.load %arg15[%c0_51, %c0_52] : memref<64x32xbf16, #tpu.memory_space<vmem>>, vector<64x32xbf16>
      tpu.vector_store %arg15[%c0_51, %c0_52], %84 {strides = array<i32>} : memref<64x32xbf16, #tpu.memory_space<vmem>>, vector<64x32xbf16>,
      %c0_53 = arith.constant 0 : index
      %c0_54 = arith.constant 0 : index
      %86 = vector.load %arg7[%c0_53, %c0_54] : memref<32x32xf32, #tpu.memory_space<vmem>>, vector<32x32xf32>
      %87 = arith.truncf %75 : vector<64x32xf32> to vector<64x32xbf16>
      %88 = arith.truncf %86 : vector<32x32xf32> to vector<32x32xbf16>
      %cst_55 = arith.constant dense<0.000000e+00> : vector<64x32xf32>
      %89 = tpu.matmul %87, %88, %cst_55 {dimension_numbers = #tpu.dot_dimension_numbers<[1], [0], [0], [1], [0, 0, 1, 1], [], []>} : vector<64x32xbf16>, vector<32x32xbf16>, vector<64x32xf32> -> vector<64x32xf32>
      %90 = arith.truncf %89 : vector<64x32xf32> to vector<64x32xbf16>
      %c0_56 = arith.constant 0 : index
      %c0_57 = arith.constant 0 : index
      %91 = vector.load %arg16[%c0_56, %c0_57] : memref<64x32xbf16, #tpu.memory_space<vmem>>, vector<64x32xbf16>
      tpu.vector_store %arg16[%c0_56, %c0_57], %90 {strides = array<i32>} : memref<64x32xbf16, #tpu.memory_space<vmem>>, vector<64x32xbf16>,
      %c0_58 = arith.constant 0 : index
      %c0_59 = arith.constant 0 : index
      %92 = vector.load %arg9[%c0_58, %c0_59] : memref<32x32xf32, #tpu.memory_space<vmem>>, vector<32x32xf32>
      %93 = arith.truncf %79 : vector<64x32xf32> to vector<64x32xbf16>
      %94 = arith.truncf %92 : vector<32x32xf32> to vector<32x32xbf16>
      %cst_60 = arith.constant dense<0.000000e+00> : vector<64x32xf32>
      %95 = tpu.matmul %93, %94, %cst_60 {dimension_numbers = #tpu.dot_dimension_numbers<[1], [0], [0], [1], [0, 0, 1, 1], [], []>} : vector<64x32xbf16>, vector<32x32xbf16>, vector<64x32xf32> -> vector<64x32xf32>
      %96 = arith.truncf %95 : vector<64x32xf32> to vector<64x32xbf16>
      %c0_61 = arith.constant 0 : index
      %c0_62 = arith.constant 0 : index
      %97 = vector.load %arg17[%c0_61, %c0_62] : memref<64x32xbf16, #tpu.memory_space<vmem>>, vector<64x32xbf16>
      tpu.vector_store %arg17[%c0_61, %c0_62], %96 {strides = array<i32>} : memref<64x32xbf16, #tpu.memory_space<vmem>>, vector<64x32xbf16>,
    } else {
    }
    %c0 = arith.constant 0 : index
    %c0_1 = arith.constant 0 : index
    %c0_2 = arith.constant 0 : index
    %3 = vector.load %arg2[%c0, %c0_1, %c0_2] : memref<1x5x32xf32, #tpu.memory_space<vmem>>, vector<1x5x32xf32>
    %4 = vector.shape_cast %3 : vector<1x5x32xf32> to vector<5x32xf32>
    %c0_3 = arith.constant 0 : index
    %c0_4 = arith.constant 0 : index
    %5 = vector.load %arg5[%c0_3, %c0_4] : memref<32x32xf32, #tpu.memory_space<vmem>>, vector<32x32xf32>
    %6 = arith.truncf %4 : vector<5x32xf32> to vector<5x32xbf16>
    %7 = arith.truncf %5 : vector<32x32xf32> to vector<32x32xbf16>
    %cst = arith.constant dense<0.000000e+00> : vector<5x32xf32>
    %8 = tpu.matmul %6, %7, %cst {dimension_numbers = #tpu.dot_dimension_numbers<[1], [0], [0], [1], [0, 0, 1, 1], [], []>} : vector<5x32xbf16>, vector<32x32xbf16>, vector<5x32xf32> -> vector<5x32xf32>
    %c0_5 = arith.constant 0 : index
    %c0_6 = arith.constant 0 : index
    %9 = vector.load %arg15[%c0_5, %c0_6] : memref<64x32xbf16, #tpu.memory_space<vmem>>, vector<64x32xbf16>
    %10 = arith.truncf %8 : vector<5x32xf32> to vector<5x32xbf16>
    %cst_7 = arith.constant dense<0.000000e+00> : vector<5x64xf32>
    %11 = tpu.matmul %10, %9, %cst_7 {dimension_numbers = #tpu.dot_dimension_numbers<[1], [1], [0], [0], [0, 0, 1, 0], [], []>} : vector<5x32xbf16>, vector<64x32xbf16>, vector<5x64xf32> -> vector<5x64xf32>
    %cst_8 = arith.constant 0.176776692 : f32
    %12 = vector.broadcast %cst_8 : f32 to vector<5x64xf32>
    %13 = arith.mulf %11, %12 : vector<5x64xf32>
    %cst_9 = arith.constant dense<0xFF800000> : vector<5xf32>
    %14 = vector.multi_reduction <maximumf>, %13, %cst_9 [1] : vector<5x64xf32> to vector<5xf32>
    %15 = vector.shape_cast %14 : vector<5xf32> to vector<5x1xf32>
    %16 = vector.broadcast %15 : vector<5x1xf32> to vector<5x64xf32>
    %17 = arith.subf %13, %16 : vector<5x64xf32>
    %18 = math.exp %17 : vector<5x64xf32>
    %cst_10 = arith.constant dense<0.000000e+00> : vector<5xf32>
    %19 = vector.multi_reduction <add>, %18, %cst_10 [1] : vector<5x64xf32> to vector<5xf32>
    %20 = vector.shape_cast %19 : vector<5xf32> to vector<5x1xf32>
    %21 = tpu.reciprocal %20 {approx = true} : vector<5x1xf32> -> vector<5x1xf32>
    %22 = vector.broadcast %21 : vector<5x1xf32> to vector<5x64xf32>
    %23 = arith.mulf %18, %22 : vector<5x64xf32>
    %c0_11 = arith.constant 0 : index
    %c0_12 = arith.constant 0 : index
    %24 = vector.load %arg16[%c0_11, %c0_12] : memref<64x32xbf16, #tpu.memory_space<vmem>>, vector<64x32xbf16>
    %25 = arith.truncf %23 : vector<5x64xf32> to vector<5x64xbf16>
    %cst_13 = arith.constant dense<0.000000e+00> : vector<5x32xf32>
    %26 = tpu.matmul %25, %24, %cst_13 {dimension_numbers = #tpu.dot_dimension_numbers<[1], [0], [0], [1], [0, 0, 1, 1], [], []>} : vector<5x64xbf16>, vector<64x32xbf16>, vector<5x32xf32> -> vector<5x32xf32>
    %c0_14 = arith.constant 0 : index
    %c0_15 = arith.constant 0 : index
    %27 = vector.load %arg8[%c0_14, %c0_15] : memref<32x32xf32, #tpu.memory_space<vmem>>, vector<32x32xf32>
    %28 = arith.truncf %26 : vector<5x32xf32> to vector<5x32xbf16>
    %29 = arith.truncf %27 : vector<32x32xf32> to vector<32x32xbf16>
    %cst_16 = arith.constant dense<0.000000e+00> : vector<5x32xf32>
    %30 = tpu.matmul %28, %29, %cst_16 {dimension_numbers = #tpu.dot_dimension_numbers<[1], [0], [0], [1], [0, 0, 1, 1], [], []>} : vector<5x32xbf16>, vector<32x32xbf16>, vector<5x32xf32> -> vector<5x32xf32>
    %31 = arith.addf %4, %30 : vector<5x32xf32>
    %c0_17 = arith.constant 0 : index
    %c0_18 = arith.constant 0 : index
    %32 = vector.load %arg10[%c0_17, %c0_18] : memref<32x32xf32, #tpu.memory_space<vmem>>, vector<32x32xf32>
    %33 = arith.truncf %31 : vector<5x32xf32> to vector<5x32xbf16>
    %34 = arith.truncf %32 : vector<32x32xf32> to vector<32x32xbf16>
    %cst_19 = arith.constant dense<0.000000e+00> : vector<5x32xf32>
    %35 = tpu.matmul %33, %34, %cst_19 {dimension_numbers = #tpu.dot_dimension_numbers<[1], [0], [0], [1], [0, 0, 1, 1], [], []>} : vector<5x32xbf16>, vector<32x32xbf16>, vector<5x32xf32> -> vector<5x32xf32>
    %c0_20 = arith.constant 0 : index
    %c0_21 = arith.constant 0 : index
    %36 = vector.load %arg11[%c0_20, %c0_21] : memref<32x32xf32, #tpu.memory_space<vmem>>, vector<32x32xf32>
    %37 = arith.truncf %31 : vector<5x32xf32> to vector<5x32xbf16>
    %38 = arith.truncf %36 : vector<32x32xf32> to vector<32x32xbf16>
    %cst_22 = arith.constant dense<0.000000e+00> : vector<5x32xf32>
    %39 = tpu.matmul %37, %38, %cst_22 {dimension_numbers = #tpu.dot_dimension_numbers<[1], [0], [0], [1], [0, 0, 1, 1], [], []>} : vector<5x32xbf16>, vector<32x32xbf16>, vector<5x32xf32> -> vector<5x32xf32>
    %c0_23 = arith.constant 0 : index
    %c0_24 = arith.constant 0 : index
    %40 = vector.load %arg17[%c0_23, %c0_24] : memref<64x32xbf16, #tpu.memory_space<vmem>>, vector<64x32xbf16>
    %41 = arith.truncf %35 : vector<5x32xf32> to vector<5x32xbf16>
    %cst_25 = arith.constant dense<0.000000e+00> : vector<64x5xf32>
    %42 = tpu.matmul %40, %41, %cst_25 {dimension_numbers = #tpu.dot_dimension_numbers<[1], [1], [0], [0], [0, 0, 1, 0], [], []>} : vector<64x32xbf16>, vector<5x32xbf16>, vector<64x5xf32> -> vector<64x5xf32>
    %cst_26 = arith.constant 0.176776692 : f32
    %43 = vector.broadcast %cst_26 : f32 to vector<64x5xf32>
    %44 = arith.mulf %42, %43 : vector<64x5xf32>
    %cst_27 = arith.constant dense<0xFF800000> : vector<64xf32>
    %45 = vector.multi_reduction <maximumf>, %44, %cst_27 [1] : vector<64x5xf32> to vector<64xf32>
    %46 = vector.shape_cast %45 : vector<64xf32> to vector<64x1xf32>
    %47 = vector.broadcast %46 : vector<64x1xf32> to vector<64x5xf32>
    %48 = arith.subf %44, %47 : vector<64x5xf32>
    %49 = math.exp %48 : vector<64x5xf32>
    %cst_28 = arith.constant dense<0.000000e+00> : vector<64xf32>
    %50 = vector.multi_reduction <add>, %49, %cst_28 [1] : vector<64x5xf32> to vector<64xf32>
    %51 = vector.shape_cast %50 : vector<64xf32> to vector<64x1xf32>
    %52 = tpu.reciprocal %51 {approx = true} : vector<64x1xf32> -> vector<64x1xf32>
    %53 = vector.broadcast %52 : vector<64x1xf32> to vector<64x5xf32>
    %54 = arith.mulf %49, %53 : vector<64x5xf32>
    %c0_29 = arith.constant 0 : index
    %c0_30 = arith.constant 0 : index
    %c0_31 = arith.constant 0 : index
    %55 = vector.load %arg3[%c0_29, %c0_30, %c0_31] : memref<1x64x32xbf16, #tpu.memory_space<vmem>>, vector<1x64x32xbf16>
    %56 = vector.shape_cast %55 : vector<1x64x32xbf16> to vector<64x32xbf16>
    %57 = arith.extf %56 : vector<64x32xbf16> to vector<64x32xf32>
    %58 = arith.truncf %54 : vector<64x5xf32> to vector<64x5xbf16>
    %59 = arith.truncf %39 : vector<5x32xf32> to vector<5x32xbf16>
    %cst_32 = arith.constant dense<0.000000e+00> : vector<64x32xf32>
    %60 = tpu.matmul %58, %59, %cst_32 {dimension_numbers = #tpu.dot_dimension_numbers<[1], [0], [0], [1], [0, 0, 1, 1], [], []>} : vector<64x5xbf16>, vector<5x32xbf16>, vector<64x32xf32> -> vector<64x32xf32>
    %c0_33 = arith.constant 0 : index
    %c0_34 = arith.constant 0 : index
    %61 = vector.load %arg12[%c0_33, %c0_34] : memref<32x32xf32, #tpu.memory_space<vmem>>, vector<32x32xf32>
    %62 = arith.truncf %60 : vector<64x32xf32> to vector<64x32xbf16>
    %63 = arith.truncf %61 : vector<32x32xf32> to vector<32x32xbf16>
    %cst_35 = arith.constant dense<0.000000e+00> : vector<64x32xf32>
    %64 = tpu.matmul %62, %63, %cst_35 {dimension_numbers = #tpu.dot_dimension_numbers<[1], [0], [0], [1], [0, 0, 1, 1], [], []>} : vector<64x32xbf16>, vector<32x32xbf16>, vector<64x32xf32> -> vector<64x32xf32>
    %65 = arith.addf %57, %64 : vector<64x32xf32>
    %c0_36 = arith.constant 0 : index
    %c0_37 = arith.constant 0 : index
    %c0_38 = arith.constant 0 : index
    %66 = vector.load %arg13[%c0_36, %c0_37, %c0_38] : memref<1x5x32xf32, #tpu.memory_space<vmem>>, vector<1x5x32xf32>
    %67 = vector.shape_cast %66 : vector<1x5x32xf32> to vector<5x32xf32>
    %68 = vector.shape_cast %31 : vector<5x32xf32> to vector<1x5x32xf32>
    tpu.vector_store %arg13[%c0_36, %c0_37, %c0_38], %68 {strides = array<i32>} : memref<1x5x32xf32, #tpu.memory_space<vmem>>, vector<1x5x32xf32>,
    %69 = arith.truncf %65 : vector<64x32xf32> to vector<64x32xbf16>
    %c0_39 = arith.constant 0 : index
    %c0_40 = arith.constant 0 : index
    %c0_41 = arith.constant 0 : index
    %70 = vector.load %arg14[%c0_39, %c0_40, %c0_41] : memref<1x64x32xbf16, #tpu.memory_space<vmem>>, vector<1x64x32xbf16>
    %71 = vector.shape_cast %70 : vector<1x64x32xbf16> to vector<64x32xbf16>
    %72 = vector.shape_cast %69 : vector<64x32xbf16> to vector<1x64x32xbf16>
    tpu.vector_store %arg14[%c0_39, %c0_40, %c0_41], %72 {strides = array<i32>} : memref<1x64x32xbf16, #tpu.memory_space<vmem>>, vector<1x64x32xbf16>,
    return
  }
  func.func @transform_0(%arg0: i32, %arg1: i32) -> (i32, i32, i32) {
    %c4_i32 = arith.constant 4 : i32
    %0 = arith.muli %arg0, %c4_i32 : i32
    %1 = arith.addi %0, %arg1 : i32
    %c0_i32 = arith.constant 0 : i32
    %c0_i32_0 = arith.constant 0 : i32
    %c0_i32_1 = arith.constant 0 : i32
    return %1, %c0_i32, %c0_i32_0 : i32, i32, i32
  }
  func.func @transform_1(%arg0: i32, %arg1: i32) -> (i32, i32, i32) {
    %c0_i32 = arith.constant 0 : i32
    %c0_i32_0 = arith.constant 0 : i32
    %c0_i32_1 = arith.constant 0 : i32
    return %arg0, %c0_i32, %c0_i32_0 : i32, i32, i32
  }
  func.func @transform_2(%arg0: i32, %arg1: i32) -> (i32, i32, i32) {
    %c0_i32 = arith.constant 0 : i32
    %c0_i32_0 = arith.constant 0 : i32
    %c0_i32_1 = arith.constant 0 : i32
    %c0_i32_2 = arith.constant 0 : i32
    return %c0_i32, %c0_i32_0, %c0_i32_1 : i32, i32, i32
  }
  func.func @transform_3(%arg0: i32, %arg1: i32) -> (i32, i32) {
    %c0_i32 = arith.constant 0 : i32
    %c0_i32_0 = arith.constant 0 : i32
    %c0_i32_1 = arith.constant 0 : i32
    return %c0_i32, %c0_i32_0 : i32, i32
  }
  func.func @transform_4(%arg0: i32, %arg1: i32) -> (i32, i32) {
    %c0_i32 = arith.constant 0 : i32
    %c0_i32_0 = arith.constant 0 : i32
    %c0_i32_1 = arith.constant 0 : i32
    return %c0_i32, %c0_i32_0 : i32, i32
  }
  func.func @transform_5(%arg0: i32, %arg1: i32) -> (i32, i32) {
    %c0_i32 = arith.constant 0 : i32
    %c0_i32_0 = arith.constant 0 : i32
    %c0_i32_1 = arith.constant 0 : i32
    return %c0_i32, %c0_i32_0 : i32, i32
  }
  func.func @transform_6(%arg0: i32, %arg1: i32) -> (i32, i32) {
    %c0_i32 = arith.constant 0 : i32
    %c0_i32_0 = arith.constant 0 : i32
    %c0_i32_1 = arith.constant 0 : i32
    return %c0_i32, %c0_i32_0 : i32, i32
  }
  func.func @transform_7(%arg0: i32, %arg1: i32) -> (i32, i32) {
    %c0_i32 = arith.constant 0 : i32
    %c0_i32_0 = arith.constant 0 : i32
    %c0_i32_1 = arith.constant 0 : i32
    return %c0_i32, %c0_i32_0 : i32, i32
  }
  func.func @transform_8(%arg0: i32, %arg1: i32) -> (i32, i32) {
    %c0_i32 = arith.constant 0 : i32
    %c0_i32_0 = arith.constant 0 : i32
    %c0_i32_1 = arith.constant 0 : i32
    return %c0_i32, %c0_i32_0 : i32, i32
  }
  func.func @transform_9(%arg0: i32, %arg1: i32) -> (i32, i32) {
    %c0_i32 = arith.constant 0 : i32
    %c0_i32_0 = arith.constant 0 : i32
    %c0_i32_1 = arith.constant 0 : i32
    return %c0_i32, %c0_i32_0 : i32, i32
  }
  func.func @transform_10(%arg0: i32, %arg1: i32) -> (i32, i32) {
    %c0_i32 = arith.constant 0 : i32
    %c0_i32_0 = arith.constant 0 : i32
    %c0_i32_1 = arith.constant 0 : i32
    return %c0_i32, %c0_i32_0 : i32, i32
  }
  func.func @transform_11(%arg0: i32, %arg1: i32) -> (i32, i32, i32) {
    %c4_i32 = arith.constant 4 : i32
    %0 = arith.muli %arg0, %c4_i32 : i32
    %1 = arith.addi %0, %arg1 : i32
    %c0_i32 = arith.constant 0 : i32
    %c0_i32_0 = arith.constant 0 : i32
    %c0_i32_1 = arith.constant 0 : i32
    return %1, %c0_i32, %c0_i32_0 : i32, i32, i32
  }
  func.func @transform_12(%arg0: i32, %arg1: i32) -> (i32, i32, i32) {
    %c4_i32 = arith.constant 4 : i32
    %0 = arith.muli %arg0, %c4_i32 : i32
    %1 = arith.addi %0, %arg1 : i32
    %c0_i32 = arith.constant 0 : i32
    %c0_i32_0 = arith.constant 0 : i32
    %c0_i32_1 = arith.constant 0 : i32
    return %1, %c0_i32, %c0_i32_0 : i32, i32, i32
  }
}

</mosaic_0001>

<bundles_post_ra>
// kernel: tpu_custom_call.1
= control target key start
LH: loop header
LB: loop body
LE: loop exit
PB: predicated region body
PF: predicated region fallthrough
CT: control target
= control target key end

     0   :  { %s2691_s0 = inlined_call_operand.vmem [shape: f32[8,5,32], index: 0, kind: input, shape index: {}]   ;;  %s2692_s1 = inlined_call_operand.vmem [shape: bf16[2,64,32], index: 1, kind: input, shape index: {}]   ;;  %s2693_s2 = inlined_call_operand.vmem [shape: bf16[1,64,32], index: 2, kind: input, shape index: {}]   ;;  %s2694_s3 = inlined_call_operand.vmem [shape: f32[32,32], index: 3, kind: input, shape index: {}]   ;;  %s2695_s4 = inlined_call_operand.vmem [shape: f32[32,32], index: 4, kind: input, shape index: {}]   ;;  %s2696_s5 = inlined_call_operand.vmem [shape: f32[32,32], index: 5, kind: input, shape index: {}]   ;;  %s2697_s6 = inlined_call_operand.vmem [shape: f32[32,32], index: 6, kind: input, shape index: {}]   ;;  %s2698_s7 = inlined_call_operand.vmem [shape: f32[32,32], index: 7, kind: input, shape index: {}]   ;;  %s2699_s8 = inlined_call_operand.vmem [shape: f32[32,32], index: 8, kind: input, shape index: {}]   ;;  %s2700_s9 = inlined_call_operand.hbm [shape: f32[32,32], index: 9, kind: input, shape index: {}]   ;;  %s2701_s10 = inlined_call_operand.hbm [shape: f32[32,32], index: 10, kind: input, shape index: {}]   ;;  %s2702_s11 = inlined_call_operand.vmem [shape: f32[8,5,32], index: 11, kind: output, shape index: {0}]   ;;  %s2703_s12 = inlined_call_operand.vmem [shape: bf16[8,64,32], index: 12, kind: output, shape index: {1}]  }
   0x1   :  { %2711 = sst [smem:[#allocation16_spill]] %s2699_s8 }
   0x2   :  { %18 = vsyncpa [#allocation6], 0 }
   0x3   :  { %19 = vsyncpa [#allocation8], 0  ;;  %s2327_s21 = smov 0   ;;  %s2329_s22 = smov 0  }
   0x4   :  { %s2331_s23 = smov 0   ;;  %s2333_s24 = smov 0  }
   0x5   :  { %s2335_s25 = smov 0  }
   0x6 LB: > { %2712 = sst [smem:[#allocation11_spill]] %s2245_s23  ;;  %s1739_s26 = sadd.s32 4294967295, %s2253_s25   ;;  %s2253_s25 = sphi %s2335_s25, %s25_s25   ;;  %s2249_s24 = sphi %s2333_s24, %s2728_s24   ;;  %s2245_s23 = sphi %s2331_s23, %s2727_s23   ;;  %s2241_s22 = sphi %s2329_s22, %s2726_s22   ;;  %s2237_s21 = sphi %s2327_s21, %s2725_s21  }
   0x7   : > { %2713 = sst [smem:[#allocation12_spill]] %s2249_s24  ;;  %s34_s27 = sadd.s32 1, %s2245_s23 }
   0x8   : > { %2714 = sst [smem:[#allocation13_spill]] %s2253_s25  ;;  %p35_p0 = scmp.ge.s32.totalorder %s34_s27, 4 }
   0x9   : > { %s37_s28 = sadd.s32 1, %s2249_s24  ;;  %p1747_p1 = scmp.ge.s32.totalorder %s2253_s25, 1 }
   0xa   : > { %p347_p2 = scmp.lt.s32.totalorder %s2253_s25, 9  ;;  %s2730_s27 = smov (%p35_p0, %s34_s27), 0 }
   0xb   : > { %2715 = sst [smem:[#allocation14_spill]] %s2730_s27  ;;  %s2732_s28 = smov (!%p35_p0, %s37_s28), %s2249_s24 }
   0xc   : > { %p2360_p3 = pnand %p1747_p1, %p347_p2  ;;  %p39_p4 = scmp.ge.s32.totalorder %s2732_s28, 2 }
   0xd   : > { %p2364_p5 = scmp.eq.s32.totalorder %s1739_s26, 0  ;;  %s2255_s13 = smov [#allocation5]  }
   0xe   : > { %s2716_s29 = scalar_select %p2360_p3, 1, 0 }
   0xf   : > { %s2717_s30 = scalar_select %p2364_p5, 1, 0 }
  0x10   : > { %p2049_p6 = pneg %p2360_p3  ;;  %s2734_s28 = smov (%p39_p4, %s2732_s28), 0 }
  0x11   : > { %2718 = sst [smem:[#allocation15_spill]] %s2734_s28  ;;  %s380_s14 = sshll.u32 %s2255_s13, 4  ;;  %s381_s14 = int_to_ptr.vmem [resolvable:$true] %s380_s14 }
  0x12   : > { %p2374_p7 = pnand %p2364_p5, %p2049_p6  ;;  %s2151_s18 = scalar_lea.hbm %s2700_s9, 512 }
  0x13   : > { %p2152_p8 = scmp.ne.s32.totalorder %s2700_s9, %s2151_s18  ;;  %p2158_p12 = scmp.lt.u32.totalorder %s2151_s18, %s2700_s9 }
  0x14   : > { %p2153_p9 = pneg %p2374_p7 }
  0x16   : > { %p2154_p10 = pnand %p2153_p9, %p2152_p8 }
  0x18   : > { %p2155_p11 = pneg %p2154_p10 }
  0x1a   : > { %p2160_p13 = pnand %p2158_p12, %p2155_p11 }
  0x1c   : > { %2163 = shalt.err (!%p2160_p13)
}
  0x1d   : > { %s2164_s28 = scalar_lea.vmem %s381_s14, 512  ;;  %p2172_p4 = scmp.lt.s32.totalorder %s381_s14, %s381_s14 }
  0x1e   : > { %p2165_p0 = scmp.ne.s32.totalorder %s381_s14, %s2164_s28  ;;  %p2173_p6 = scmp.lt.s32.totalorder %s2164_s28, %s2164_s28 }
  0x20   : > { %p2167_p1 = pnand %p2165_p0, %p2153_p9  ;;  %p2174_p5 = por %p2173_p6, %p2172_p4 }
  0x22   : > { %p2168_p2 = pneg %p2167_p1 }
  0x24   : > { %p2175_p3 = pnand %p2174_p5, %p2168_p2 }
  0x26   : > { %2178 = shalt.err (!%p2175_p3)
}
  0x27   : > { %s2256_s16 = smov 128   ;;  %s2257_s17 = smov 8  }
  0x28   : > { %2052 = dma.hbm_to_vmem [thread:$0]  (!%p2374_p7), %s2700_s9, 512, %s381_s14, [#allocation6], %s2256_s16, %s2256_s16, %s2257_s17  }
  0x29   : > { %s2258_s20 = smov [#allocation7]   ;;  %s2179_s24 = scalar_lea.hbm %s2701_s10, 512 }
  0x2a   : > { %s393_s26 = sshll.u32 %s2258_s20, 4  ;;  %p2180_p3 = scmp.ne.s32.totalorder %s2701_s10, %s2179_s24  ;;  %s394_s26 = int_to_ptr.vmem [resolvable:$true] %s393_s26 }
  0x2b   : > { %p2186_p10 = scmp.lt.u32.totalorder %s2179_s24, %s2701_s10 }
  0x2c   : > { %p2182_p5 = pnand %p2180_p3, %p2153_p9 }
  0x2e   : > { %p2183_p8 = pneg %p2182_p5 }
  0x30   : > { %p2188_p11 = pnand %p2186_p10, %p2183_p8 }
  0x32   : > { %2191 = shalt.err (!%p2188_p11)
}
  0x33   : > { %s2192_s14 = scalar_lea.vmem %s394_s26, 512  ;;  %p2200_p1 = scmp.lt.s32.totalorder %s394_s26, %s394_s26 }
  0x34   : > { %p2193_p12 = scmp.ne.s32.totalorder %s394_s26, %s2192_s14  ;;  %p2201_p2 = scmp.lt.s32.totalorder %s2192_s14, %s2192_s14 }
  0x36   : > { %p2195_p13 = pnand %p2193_p12, %p2153_p9  ;;  %p2202_p4 = por %p2201_p2, %p2200_p1 }
  0x38   : > { %p2196_p0 = pneg %p2195_p13 }
  0x3a   : > { %p2203_p6 = pnand %p2202_p4, %p2196_p0 }
  0x3c   : > { %2206 = shalt.err (!%p2203_p6)
}
  0x3d   : > { %2055 = dma.hbm_to_vmem [thread:$0]  (!%p2374_p7), %s2701_s10, 512, %s394_s26, [#allocation8], %s2256_s16, %s2256_s16, %s2257_s17  }
  0x3e   : > { %p2720_p3 = scmp.ne.s32.totalorder %s2716_s29, 0 }
  0x3f   : > { %p2721_p5 = scmp.ne.s32.totalorder (!%p2720_p3), %s2717_s30, 0 }
  0x40   : > { %428 = sbr.rel (%p2720_p3) target bundleno = 2715 (0xa9b), region = 64 }
  0x47   : > { %2228 = dma.done.wait (%p2721_p5), [#allocation6], 512  }
  0x48   : > { %2230 = vsyncadd (%p2721_p5), [#allocation6], 4294966784 }
  0x49   : > { %2232 = dma.done.wait (%p2721_p5), [#allocation8], 512  }
  0x4a   : > { %2234 = vsyncadd (%p2721_p5), [#allocation8], 4294966784  ;;  %s1754_s8 = sshll.u32 %s2241_s22, 2  ;;  %p496_p7 = scmp.lt.s32.totalorder %s2241_s22, 1 }
  0x4b   : > { %s489_s24 = sadd.s32 %s2237_s21, %s1754_s8  ;;  %p1763_p8 = scmp.ne.s32.totalorder %s2237_s21, 0 }
  0x4c   : > { %p490_p9 = scmp.lt.s32.totalorder %s489_s24, 7  ;;  %s2736_s22 = smov (!%p496_p7, %s2241_s22), 1  ;;  %v563_v0 = vld [vmem:[%s2695_s4] sm:$0xff] (!%p1763_p8)  ;;  %v564_v1 = vld [vmem:[%s2695_s4 + $0x8] sm:$0xff] (!%p1763_p8)  ;;  %v565_v2 = vld [vmem:[%s2695_s4 + $0x10] sm:$0xff] (!%p1763_p8)  ;;  %vm573_vm0 = vcmask (!%p1763_p8), 261120  }
  0x4d   : > { %s1808_s25 = sshll.u32 %s2736_s22, 5  ;;  %522 = sbr.rel (%p1763_p8) target bundleno = 323 (0x143), region = 76  ;;  %v571_v3 = vpack.c.bf16 (!%p1763_p8), %v564_v1, %v563_v0  ;;  %v566_v4 = vld [vmem:[%s2695_s4 + $0x18] sm:$0xff] (!%p1763_p8)  ;;  %v1819_v6 = vld [vmem:[%s2693_s2] sm:$0xff] (!%p1763_p8)   ;;  %v1851_v12 = vld [vmem:[%s2693_s2 + $0x10] sm:$0xff] (!%p1763_p8)  }
  0x4e   : > { %s2738_s24 = smov (!%p490_p9, %s489_s24), 7  ;;  %s2437_s17 = scalar_lea.vmem %s2692_s1, %s1808_s25  ;;  %v572_v7 = vpack.c.bf16 (!%p1763_p8), %v566_v4, %v565_v2  ;;  %v1820_v10 = vunpack.c.l.bf16 (!%p1763_p8), %v1819_v6  ;;  %v1821_v14 = vunpack.c.h.bf16 (!%p1763_p8), %v1819_v6  ;;  %v1828_v17 = vunpack.c.l.bf16 (!%p1763_p8), %v1851_v12  ;;  %v1850_v18 = vld [vmem:[%s2693_s2 + $0x8] sm:$0xff] (!%p1763_p8)   ;;  %v1852_v20 = vld [vmem:[%s2693_s2 + $0x18] sm:$0xff] (!%p1763_p8)   ;;  %v659_v29 = vld [vmem:[%s2696_s5] sm:$0xff] (!%p1763_p8) }
  0x4f   : > { %s1755_s29 = sshll.u32 %s2738_s24, 3  ;;  %s1809_s28 = sshll.u32 %s2738_s24, 5  ;;  %v2468_v5 = vld [vmem:[%s2437_s17] sm:$0xff] (!%p1763_p8)   ;;  %v2476_v11 = vld [vmem:[%s2437_s17 + $0x10] sm:$0xff] (!%p1763_p8)   ;;  %v2482_v13 = vld [vmem:[%s2437_s17 + $0x8] sm:$0xff] (!%p1763_p8)   ;;  %1912 = vmatprep.subr.bf16.mxu0 (!%p1763_p8), %v571_v3  ;;  %2036 = vmatprep.subr.bf16.mxu1 (!%p1763_p8), %v571_v3  ;;  %v1829_v22 = vunpack.c.h.bf16 (!%p1763_p8), %v1851_v12  ;;  %v1824_v27 = vunpack.c.l.bf16 (!%p1763_p8), %v1850_v18  ;;  %v1825_v28 = vunpack.c.h.bf16 (!%p1763_p8), %v1850_v18  ;;  %v1832_v34 = vunpack.c.l.bf16 (!%p1763_p8), %v1852_v20 }
  0x50   : > { %s2442_s19 = scalar_lea.vmem %s2691_s0, %s1755_s29  ;;  %s2447_s13 = scalar_lea.vmem %s2702_s11, %s1755_s29  ;;  %v531_v8 = vunpack.c.l.bf16 (!%p1763_p8), %v2468_v5  ;;  %v532_v9 = vunpack.c.h.bf16 (!%p1763_p8), %v2468_v5  ;;  %v535_v15 = vunpack.c.l.bf16 (!%p1763_p8), %v2476_v11  ;;  %v536_v16 = vunpack.c.h.bf16 (!%p1763_p8), %v2476_v11  ;;  %v529_v19 = vld [vmem:[%s2437_s17 + $0x18] sm:$0xff] (!%p1763_p8)   ;;  %1913 = vmatpush3.bf16.msra.mxu0 (!%p1763_p8), %v571_v3  ;;  %2038 = vmatpush3.bf16.msra.mxu1 (!%p1763_p8), %v571_v3  ;;  %v660_v30 = vld [vmem:[%s2696_s5 + $0x8] sm:$0xff] (!%p1763_p8)  ;;  %v770_v35 = vld [vmem:[%s2698_s7] sm:$0xff] (!%p1763_p8) }
  0x51   : > { %s2452_s22 = scalar_lea.vmem %s2703_s12, %s1809_s28  ;;  %v533_v23 = vunpack.c.l.bf16 (!%p1763_p8), %v2482_v13  ;;  %v534_v24 = vunpack.c.h.bf16 (!%p1763_p8), %v2482_v13  ;;  %1914 = vmatprep.subr.bf16.mxu0 (!%p1763_p8), %v572_v7  ;;  %2037 = vmatprep.subr.bf16.mxu1 (!%p1763_p8), %v572_v7  ;;  %v537_v32 = vunpack.c.l.bf16 (!%p1763_p8), %v529_v19  ;;  %v538_v33 = vunpack.c.h.bf16 (!%p1763_p8), %v529_v19  ;;  %v771_v36 = vld [vmem:[%s2698_s7 + $0x8] sm:$0xff] (!%p1763_p8)  ;;  %v772_v41 = vld [vmem:[%s2698_s7 + $0x10] sm:$0xff] (!%p1763_p8)  ;;  %v773_v42 = vld [vmem:[%s2698_s7 + $0x18] sm:$0xff] (!%p1763_p8) }
  0x52   : > { %v555_v21 = vadd.f32 (!%p1763_p8), %v1820_v10, %v531_v8  ;;  %v556_v25 = vadd.f32 (!%p1763_p8), %v1821_v14, %v532_v9  ;;  %v559_v26 = vadd.f32 (!%p1763_p8), %v1828_v17, %v535_v15  ;;  %v560_v31 = vadd.f32 (!%p1763_p8), %v1829_v22, %v536_v16  ;;  %v661_v46 = vld [vmem:[%s2696_s5 + $0x10] sm:$0xff] (!%p1763_p8)  ;;  %v662_v47 = vld [vmem:[%s2696_s5 + $0x18] sm:$0xff] (!%p1763_p8) }
  0x53   : > { %v557_v38 = vadd.f32 (!%p1763_p8), %v1824_v27, %v533_v23  ;;  %v558_v39 = vadd.f32 (!%p1763_p8), %v1825_v28, %v534_v24  ;;  %v1833_v40 = vunpack.c.h.bf16 (!%p1763_p8), %v1852_v20  ;;  %v561_v44 = vadd.f32 (!%p1763_p8), %v1832_v34, %v537_v32 }
  0x54   : > { %v567_v37 = vpack.c.bf16 %v556_v25, %v555_v21  ;;  %1915 = vmatpush3.bf16.msra.mxu0 %v572_v7  ;;  %2039 = vmatpush3.bf16.msra.mxu1 %v572_v7  ;;  %v569_v43 = vpack.c.bf16 %v560_v31, %v559_v26  ;;  %v663_v45 = vpack.c.bf16 %v660_v30, %v659_v29 }
  0x55   : > { %v568_v48 = vpack.c.bf16 %v558_v39, %v557_v38  ;;  %v562_v49 = vadd.f32 %v1833_v40, %v538_v33  ;;  %v774_v50 = vpack.c.bf16 %v771_v36, %v770_v35  ;;  %v775_v51 = vpack.c.bf16 %v773_v42, %v772_v41 }
  0x56   : > { %1916 = vmatprep.mubr.msk.bf16.mxu0 %vm573_vm0, %v567_v37  ;;  %1920 = vmatprep.mubr.msk.bf16.mxu1 %vm573_vm0, %v569_v43  ;;  %v664_v53 = vpack.c.bf16 %v662_v47, %v661_v46 }
  0x57   : > { %1924 = vmatprep.subr.bf16.mxu1 %v663_v45  ;;  %1917 = vmatmul.mubr.msk.bf16.vlgmr.msra.gmra.mrb[0].mxu0 %vm573_vm0, %v568_v48  ;;  %v570_v52 = vpack.c.bf16 %v562_v49, %v561_v44 }
  0x58   : > { %1936 = vmatprep.subr.bf16.mxu0 %v774_v50  ;;  %1940 = vmatprep.mubr.msk.bf16.mxu0 %vm573_vm0, %v567_v37 }
  0x59   : > { %1937 = vmatpush3.bf16.msra.mxu0 %v774_v50  ;;  %1921 = vmatmul.mubr.msk.bf16.vlgmr.msra.gmra.mrb[0].mxu1 %vm573_vm0, %v570_v52 }
  0x5a   : > { %1938 = vmatprep.subr.bf16.mxu0 %v775_v51  ;;  %1925 = vmatpush3.bf16.msra.mxu1 %v663_v45 }
  0x5b   : > { %1928 = vmatprep.mubr.msk.bf16.mxu1 %vm573_vm0, %v2468_v5  ;;  %1926 = vmatprep.subr.bf16.mxu1 %v664_v53 }
  0x5d   : > { %1939 = vmatpush3.bf16.msra.mxu0 %v775_v51 }
  0x5e   : > { %1927 = vmatpush3.bf16.msra.mxu1 %v664_v53 }
  0x60   : > { %1941 = vmatmul.mubr.msk.bf16.vlgmr.msra.gmra.mrb[4].mxu0 %vm573_vm0, %v568_v48 }
  0x61   : > { %1944 = vmatprep.mubr.msk.bf16.mxu0 %vm573_vm0, %v569_v43  ;;  %1929 = vmatmul.mubr.msk.bf16.vlgmr.msra.gmra.mrb[4].mxu1 %vm573_vm0, %v2482_v13 }
  0x62   : > { %1932 = vmatprep.mubr.msk.bf16.mxu1 %vm573_vm0, %v2476_v11 }
  0x68   : > { %1945 = vmatmul.mubr.msk.bf16.gmra.mrb[8].mxu0 %vm573_vm0, %v570_v52 }
  0x69   : > { %1933 = vmatmul.mubr.msk.bf16.gmra.mrb[8].mxu1 %vm573_vm0, %v529_v19 }
 0x12a   : > { %v1918_v54 = vpop.f32.mrb[0].mxu0 }
 0x12b   : > { %v620_v55 = vpop.f32.mrb[1].mxu0 }
 0x12c   : > { %v1922_v56 = vpop.f32.mrb[0].mxu1  ;;  %v1919_v57 = vpop.f32.mrb[2].mxu0 }
 0x12d   : > { %v636_v58 = vpop.f32.mrb[1].mxu1  ;;  %v652_v59 = vpack.c.bf16 %v1919_v57, %v1918_v54  ;;  %v623_v60 = vpop.f32.mrb[3].mxu0 }
 0x12e   : > { %v1923_v61 = vpop.f32.mrb[2].mxu1  ;;  %v651_v62 = vpack.c.bf16 %v623_v60, %v620_v55 }
 0x12f   : > { %656 = vst.msk [vmem:[#allocation2 + $0x8] sm:$0xff] %vm573_vm0, %v652_v59  ;;  %v654_v63 = vpack.c.bf16 %v1923_v61, %v1922_v56  ;;  %v639_v0 = vpop.f32.mrb[3].mxu1 }
 0x130   : > { %655 = vst.msk [vmem:[#allocation2] sm:$0xff] %vm573_vm0, %v651_v62  ;;  %v653_v1 = vpack.c.bf16 %v639_v0, %v636_v58 }
 0x131   : > { %658 = vst.msk [vmem:[#allocation2 + $0x18] sm:$0xff] %vm573_vm0, %v654_v63 }
 0x132   : > { %657 = vst.msk [vmem:[#allocation2 + $0x10] sm:$0xff] %vm573_vm0, %v653_v1 }
 0x133   : > { %v1942_v2 = vpop.f32.mrb[4].mxu0 }
 0x134   : > { %v810_v3 = vpop.f32.mrb[5].mxu0  ;;  %v1930_v4 = vpop.f32.mrb[4].mxu1 }
 0x135   : > { %v1943_v5 = vpop.f32.mrb[6].mxu0  ;;  %v731_v6 = vpop.f32.mrb[5].mxu1 }
 0x136   : > { %v842_v7 = vpack.c.bf16 %v1943_v5, %v1942_v2  ;;  %v813_v8 = vpop.f32.mrb[7].mxu0  ;;  %v1931_v9 = vpop.f32.mrb[6].mxu1 }
 0x137   : > { %v841_v10 = vpack.c.bf16 %v813_v8, %v810_v3  ;;  %v763_v11 = vpack.c.bf16 %v1931_v9, %v1930_v4  ;;  %v734_v12 = vpop.f32.mrb[7].mxu1 }
 0x138   : > { %846 = vst.msk [vmem:[#allocation4 + $0x8] sm:$0xff] %vm573_vm0, %v842_v7  ;;  %v762_v13 = vpack.c.bf16 %v734_v12, %v731_v6 }
 0x139   : > { %845 = vst.msk [vmem:[#allocation4] sm:$0xff] %vm573_vm0, %v841_v10  ;;  %767 = vst.msk [vmem:[#allocation3 + $0x8] sm:$0xff] %vm573_vm0, %v763_v11 }
 0x13a   : > { %766 = vst.msk [vmem:[#allocation3] sm:$0xff] %vm573_vm0, %v762_v13 }
 0x13b   : > { %v1946_v14 = vpop.f32.mrb[8].mxu0 }
 0x13c   : > { %v826_v15 = vpop.f32.mrb[9].mxu0  ;;  %v1934_v16 = vpop.f32.mrb[8].mxu1 }
 0x13d   : > { %v1947_v17 = vpop.f32.mrb[10].mxu0  ;;  %v747_v18 = vpop.f32.mrb[9].mxu1 }
 0x13e   : > { %v844_v19 = vpack.c.bf16 %v1947_v17, %v1946_v14  ;;  %v829_v20 = vpop.f32.mrb[11].mxu0  ;;  %v1935_v21 = vpop.f32.mrb[10].mxu1 }
 0x13f   : > { %v843_v22 = vpack.c.bf16 %v829_v20, %v826_v15  ;;  %v765_v23 = vpack.c.bf16 %v1935_v21, %v1934_v16  ;;  %v750_v24 = vpop.f32.mrb[11].mxu1 }
 0x140   : > { %848 = vst.msk [vmem:[#allocation4 + $0x18] sm:$0xff] %vm573_vm0, %v844_v19  ;;  %v764_v25 = vpack.c.bf16 %v750_v24, %v747_v18 }
 0x141   : > { %847 = vst.msk [vmem:[#allocation4 + $0x10] sm:$0xff] %vm573_vm0, %v843_v22  ;;  %769 = vst.msk [vmem:[#allocation3 + $0x18] sm:$0xff] %vm573_vm0, %v765_v23 }
 0x142   : > { %768 = vst.msk [vmem:[#allocation3 + $0x10] sm:$0xff] %vm573_vm0, %v764_v25 }
 0x143 PF: > { %v850_v26 = vld [vmem:[%s2694_s3] sm:$0xff]  ;;  %v851_v27 = vld [vmem:[%s2694_s3 + $0x8] sm:$0xff]  ;;  %v852_v28 = vld [vmem:[%s2694_s3 + $0x10] sm:$0xff]  ;;  %v2259_v29 = vmov 0.0   ;;  %vm2260_vm1 = vmmov 0   ;;  %vm857_vm2 = vcmask 261120  }
 0x144   : > { %1948 = vmatprep.subr.bf16.mxu1 %v2259_v29  ;;  %v855_v30 = vpack.c.bf16 %v851_v27, %v850_v26  ;;  %v853_v31 = vld [vmem:[%s2694_s3 + $0x18] sm:$0xff]  ;;  %1952 = vmatprep.mubr.msk.bf16.mxu1 %vm2260_vm1, %v2259_v29  ;;  %v2565_v33 = vld [vmem:[%s2442_s19] sm:$0x1f]  ;;  %v902_v37 = vld [vmem:[#allocation2 + $0x8] sm:$0xff]  ;;  %vm962_vm3 = vcmask 520192   ;;  %vm979_vm4 = vcmask 523264  }
 0x145   : > { %1968 = vmatprep.subr.bf16.mxu0 %v2259_v29  ;;  %1976 = vmatprep.mubr.msk.bf16.mxu0 %vm2260_vm1, %v2259_v29  ;;  %v856_v32 = vpack.c.bf16 %v853_v31, %v852_v28  ;;  %v854_v34 = vpack.c.bf16 %v2565_v33, %v2565_v33  ;;  %v901_v35 = vld [vmem:[#allocation2] sm:$0xff]  ;;  %v913_v38 = vsel %vm857_vm2, %v902_v37, 0  ;;  %v903_v39 = vld [vmem:[#allocation2 + $0x10] sm:$0xff]  ;;  %v904_v41 = vld [vmem:[#allocation2 + $0x18] sm:$0xff]  ;;  %s2722_s24 = sld [smem:[#allocation16_spill]]  ;;  %vm1552_vm5 = vcmask 258048  }
 0x146   : > { %1949 = vmatpush3.bf16.msra.mxu1 %v855_v30  ;;  %v910_v36 = vsel %vm857_vm2, %v901_v35, 0  ;;  %v916_v40 = vsel %vm857_vm2, %v903_v39, 0  ;;  %v919_v42 = vsel %vm857_vm2, %v904_v41, 0  ;;  %v974_v59 = vld [vmem:[#allocation3] sm:$0xff]  ;;  %v975_v60 = vld [vmem:[#allocation3 + $0x8] sm:$0xff]  ;;  %v1025_v6 = vld [vmem:[%s2697_s6 + $0x10] sm:$0xff] }
 0x147   : > { %1950 = vmatprep.subr.bf16.mxu1 %v2259_v29  ;;  %1969 = vmatpush3.bf16.msra.mxu0 %v974_v59  ;;  %v1023_v0 = vld [vmem:[%s2697_s6] sm:$0xff]  ;;  %v1024_v1 = vld [vmem:[%s2697_s6 + $0x8] sm:$0xff]  ;;  %v1026_v7 = vld [vmem:[%s2697_s6 + $0x18] sm:$0xff]  ;;  %vm1385_vm6 = vcmask 1041408   ;;  %vm1386_vm7 = vcmask 1042432   ;;  %vm1263_vm8 = vcmask 39936  }
 0x148   : > { %1970 = vmatprep.subr.bf16.mxu0 %v2259_v29  ;;  %v977_v62 = vld [vmem:[#allocation3 + $0x18] sm:$0xff]  ;;  %v1028_v4 = vpack.c.bf16 %v1024_v1, %v1023_v0  ;;  %v1029_v8 = vpack.c.bf16 %v1026_v7, %v1025_v6  ;;  %v1124_v9 = vld [vmem:[#allocation5] sm:$0xff]  ;;  %v1125_v10 = vld [vmem:[#allocation5 + $0x8] sm:$0xff]  ;;  %vm1586_vm9 = vcmask 257024  }
 0x149   : > { %v976_v61 = vld [vmem:[#allocation3 + $0x10] sm:$0xff]  ;;  %v1128_v11 = vpack.c.bf16 %v1125_v10, %v1124_v9  ;;  %v1127_v24 = vld [vmem:[#allocation5 + $0x18] sm:$0xff] }
 0x14a   : > { %1951 = vmatpush3.bf16.msra.mxu1 %v856_v32  ;;  %v1126_v22 = vld [vmem:[#allocation5 + $0x10] sm:$0xff]  ;;  %v1170_v32 = vld [vmem:[#allocation4] sm:$0xff] }
 0x14b   : > { %1956 = vmatprep.subr.bf16.mxu1 %v2259_v29  ;;  %1971 = vmatpush3.bf16.msra.mxu0 %v975_v60  ;;  %s2723_s29 = smov %s2722_s24  ;;  %v1074_v12 = vld [vmem:[%s2722_s24] sm:$0xff]  ;;  %v1129_v25 = vpack.c.bf16 %v1127_v24, %v1126_v22 }
 0x14c   : > { %1972 = vmatprep.subr.bf16.mxu0 %v2259_v29  ;;  %v1075_v13 = vld [vmem:[%s2723_s29 + $0x8] sm:$0xff]  ;;  %v1076_v20 = vld [vmem:[%s2723_s29 + $0x10] sm:$0xff]  ;;  %v1077_v21 = vld [vmem:[%s2723_s29 + $0x18] sm:$0xff] }
 0x14d   : > { %1953 = vmatmul.mubr.msk.bf16.vlgmr.msra.gmra.mrb[0].mxu1 %vm857_vm2, %v854_v34  ;;  %v1079_v15 = vpack.c.bf16 %v1075_v13, %v1074_v12  ;;  %v1080_v23 = vpack.c.bf16 %v1077_v21, %v1076_v20  ;;  %v2261_v34 = vmov 65535  }
 0x14e   : > { %1964 = vmatprep.mubr.msk.bf16.mxu1 %vm2260_vm1, %v2259_v29  ;;  %v1387_v35 = vsel %vm1385_vm6, 4294967295, %v2261_v34 }
 0x14f   : > { %1973 = vmatpush3.bf16.msra.mxu0 %v976_v61 }
 0x150   : > { %1974 = vmatprep.subr.bf16.mxu0 %v2259_v29 }
 0x153   : > { %1957 = vmatpush3.bf16.xpose.msra.mxu1 %v910_v36  ;;  %1975 = vmatpush3.bf16.msra.mxu0 %v977_v62 }
 0x154   : > { %1958 = vmatprep.subr.bf16.mxu1 %v2259_v29  ;;  %1980 = vmatprep.subr.bf16.mxu0 %v2259_v29 }
 0x15b   : > { %1959 = vmatpush3.bf16.xpose.msra.mxu1 %v913_v38  ;;  %v1388_v38 = vsel %vm1386_vm7, %v1387_v35, 0 }
 0x15c   : > { %1960 = vmatprep.subr.bf16.mxu1 %v2259_v29 }
 0x163   : > { %1961 = vmatpush3.bf16.xpose.msra.mxu1 %v916_v40 }
 0x164   : > { %1962 = vmatprep.subr.bf16.mxu1 %v2259_v29 }
 0x16b   : > { %1963 = vmatpush3.bf16.xpose.msra.mxu1 %v919_v42 }
 0x16c   : > { %1996 = vmatprep.subr.bf16.mxu1 %v2259_v29 }
 0x220   : > { %v895_v43 = vpop.f32.mrb[0].mxu1 }
 0x221   : > { %v905_v44 = vpack.c.bf16 %v895_v43, %v895_v43  ;;  %v1954_v45 = vpop.f32.mrb[1].mxu1 }
 0x222   : > { %v898_v46 = vpop.f32.mrb[2].mxu1 }
 0x223   : > { %v1955_v47 = vpop.f32.mrb[3].mxu1  ;;  %1965 = vmatmul.mubr.msk.bf16.vlgmr.msra.gmra.mrb[4].mxu1 %vm857_vm2, %v905_v44 }
 0x224   : > { %2000 = vmatprep.mubr.msk.bf16.mxu1 %vm2260_vm1, %v2259_v29  ;;  %1997 = vmatpush3.bf16.msra.mxu1 %v1128_v11 }
 0x225   : > { %1998 = vmatprep.subr.bf16.mxu1 %v2259_v29 }
 0x228   : > { %1999 = vmatpush3.bf16.msra.mxu1 %v1129_v25 }
 0x2f6   : > { %v955_v48 = vpop.f32.mrb[4].mxu1 }
 0x2f7   : > { %v961_v49 = vmul.f32 0.17677669, %v955_v48  ;;  %v1966_v50 = vpop.f32.mrb[5].mxu1  ;;  %v1171_v48 = vld [vmem:[#allocation4 + $0x8] sm:$0xff] }
 0x2f8   : > { %v958_v51 = vpop.f32.mrb[6].mxu1  ;;  %v1173_v50 = vld [vmem:[#allocation4 + $0x18] sm:$0xff] }
 0x2f9   : > { %v1967_v52 = vpop.f32.mrb[7].mxu1  ;;  %v963_v53 = vsel %vm962_vm3, %v961_v49, -inf }
 0x2fa   : > { %964 = vmax.xlane.f32.xlu0 %v963_v53 }
 0x387   : > { %v965_v54 = vpop.xlane.xlu0 %964 }
 0x388   : > { %v966_v55 = vsub.f32 %v961_v49, %v965_v54  ;;  %v1172_v49 = vld [vmem:[#allocation4 + $0x10] sm:$0xff] }
 0x38a   : > { %v967_v56 = vmul.f32 1.442695, %v966_v55 }
 0x38c   : > { %2115 = vpow2.f32 %v967_v56 }
 0x396   : > { %v2116_v57 = vpop.eup %2115 }
 0x397   : > { %v969_v58 = vsel %vm962_vm3, %v2116_v57, 0.0 }
 0x398   : > { %970 = vadd.xlane.f32.xlu0 %v969_v58 }
 0x425   : > { %v971_v63 = vpop.xlane.xlu0 %970 }
 0x426   : > { %2117 = vrcp.f32 %v971_v63 }
 0x430   : > { %v2118_v2 = vpop.eup %2117 }
 0x431   : > { %v973_v3 = vmul.f32 %v2118_v2, %v2116_v57 }
 0x433   : > { %v978_v5 = vpack.c.bf16 %v973_v3, %v973_v3 }
 0x435   : > { %1977 = vmatmul.mubr.msk.bf16.vlgmr.msra.gmra.mrb[0].mxu0 %vm979_vm4, %v978_v5 }
 0x436   : > { %1981 = vmatpush3.bf16.msra.mxu0 %v1028_v4  ;;  %1984 = vmatprep.mubr.msk.bf16.mxu0 %vm2260_vm1, %v2259_v29 }
 0x437   : > { %1982 = vmatprep.subr.bf16.mxu0 %v2259_v29 }
 0x43a   : > { %1983 = vmatpush3.bf16.msra.mxu0 %v1029_v8 }
 0x43b   : > { %1988 = vmatprep.subr.bf16.mxu0 %v2259_v29 }
 0x508   : > { %v1017_v14 = vpop.f32.mrb[0].mxu0 }
 0x509   : > { %v1027_v16 = vpack.c.bf16 %v1017_v14, %v1017_v14  ;;  %v1978_v17 = vpop.f32.mrb[1].mxu0 }
 0x50a   : > { %v1020_v18 = vpop.f32.mrb[2].mxu0 }
 0x50b   : > { %v1979_v19 = vpop.f32.mrb[3].mxu0  ;;  %1985 = vmatmul.mubr.msk.bf16.vlgmr.msra.gmra.mrb[4].mxu0 %vm857_vm2, %v1027_v16 }
 0x50c   : > { %1989 = vmatpush3.bf16.msra.mxu0 %v1079_v15  ;;  %1992 = vmatprep.mubr.msk.bf16.mxu0 %vm2260_vm1, %v2259_v29 }
 0x50d   : > { %1990 = vmatprep.subr.bf16.mxu0 %v2259_v29 }
 0x510   : > { %1991 = vmatpush3.bf16.msra.mxu0 %v1080_v23 }
 0x5de   : > { %v1067_v26 = vpop.f32.mrb[4].mxu0 }
 0x5df   : > { %v1073_v27 = vadd.f32 %v1067_v26, %v2565_v33  ;;  %v1986_v28 = vpop.f32.mrb[5].mxu0 }
 0x5e0   : > { %v1070_v29 = vpop.f32.mrb[6].mxu0 }
 0x5e1   : > { %v1078_v30 = vpack.c.bf16 %v1073_v27, %v1073_v27  ;;  %1553 = vst.msk [vmem:[%s2447_s13] sm:$0x1f] %vm1552_vm5, %v1073_v27  ;;  %v1987_v31 = vpop.f32.mrb[7].mxu0 }
 0x5e3   : > { %1993 = vmatmul.mubr.msk.bf16.vlgmr.msra.gmra.mrb[8].mxu0 %vm857_vm2, %v1078_v30  ;;  %2001 = vmatmul.mubr.msk.bf16.vlgmr.msra.gmra.mrb[8].mxu1 %vm857_vm2, %v1078_v30 }
 0x5e4   : > { %2006 = vmatprep.mubr.msk.bf16.mxu0 %vm857_vm2, %v1170_v32 }
 0x6b6   : > { %v1118_v36 = vpop.f32.mrb[8].mxu0  ;;  %v1164_v37 = vpop.f32.mrb[8].mxu1 }
 0x6b7   : > { %v1174_v33 = vpack.c.bf16 %v1118_v36, %v1118_v36  ;;  %v1372_v39 = vpack.c.bf16 %v1164_v37, %v1164_v37  ;;  %v1994_v40 = vpop.f32.mrb[9].mxu0  ;;  %v2002_v41 = vpop.f32.mrb[9].mxu1 }
 0x6b8   : > { %v1121_v42 = vpop.f32.mrb[10].mxu0  ;;  %v1167_v43 = vpop.f32.mrb[10].mxu1 }
 0x6b9   : > { %v1188_v44 = vsel %vm857_vm2, %v1174_v33, 0  ;;  %v1390_v45 = vand.u32 %v1388_v38, %v1372_v39  ;;  %v1995_v46 = vpop.f32.mrb[11].mxu0  ;;  %v2003_v47 = vpop.f32.mrb[11].mxu1  ;;  %2040 = vmatprep.subr.msk.bf16.mxu0 %vm857_vm2, %v1174_v33 }
 0x6ba   : > { %2005 = vmatpush3.bf16.xpose.msra.mxu0 %v1188_v44 }
 0x6bb   : > { %2014 = vmatprep.subr.bf16.mxu1 %v1390_v45 }
 0x6bc   : > { %2015 = vmatpush3.bf16.msra.mxu1 %v1390_v45 }
 0x6c1   : > { %2007 = vmatmul.mubr.msk.bf16.vlgmr.msra.gmra.mrb[12].mxu0 %vm857_vm2, %v1171_v48 }
 0x6c2   : > { %2010 = vmatprep.mubr.msk.bf16.mxu0 %vm857_vm2, %v1172_v49 }
 0x6c9   : > { %2011 = vmatmul.mubr.msk.bf16.gmra.mrb[16].mxu0 %vm857_vm2, %v1173_v50 }
 0x794   : > { %v2008_v51 = vpop.f32.mrb[12].mxu0 }
 0x795   : > { %v1257_v52 = vmul.f32 0.17677669, %v2008_v51  ;;  %v1224_v53 = vpop.f32.mrb[13].mxu0  ;;  %v1457_v51 = vld [vmem:[#allocation7] sm:$0xff] }
 0x796   : > { %v1255_v54 = vmul.f32 0.17677669, %v1224_v53  ;;  %v2009_v55 = vpop.f32.mrb[14].mxu0  ;;  %v1459_v53 = vld [vmem:[#allocation7 + $0x10] sm:$0xff] }
 0x797   : > { %v1227_v56 = vpop.f32.mrb[15].mxu0  ;;  %v1270_v57 = vsel %vm1263_vm8, %v1257_v52, -inf  ;;  %v1258_v60 = vmul.f32 0.17677669, %v2009_v55  ;;  %v1460_v55 = vld [vmem:[#allocation7 + $0x18] sm:$0xff] }
 0x798   : > { %v1256_v58 = vmul.f32 0.17677669, %v1227_v56  ;;  %1271 = vmax.xlane.f32.xlu0 %v1270_v57  ;;  %v1264_v59 = vsel %vm1263_vm8, %v1255_v54, -inf  ;;  %v1466_v56 = vpack.c.bf16 %v1460_v55, %v1459_v53 }
 0x799   : > { %1265 = vmax.xlane.f32.xlu1 %v1264_v59  ;;  %v1273_v5 = vsel %vm1263_vm8, %v1258_v60, -inf }
 0x79a   : > { %v1267_v62 = vsel %vm1263_vm8, %v1256_v58, -inf }
 0x79c   : > { %v2012_v61 = vpop.f32.mrb[16].mxu0 }
 0x79d   : > { %1268 = vmax.xlane.f32.xlu1 %v1267_v62  ;;  %v1240_v63 = vpop.f32.mrb[17].mxu0  ;;  %v1261_v3 = vmul.f32 0.17677669, %v2012_v61 }
 0x79e   : > { %v1259_v0 = vmul.f32 0.17677669, %v1240_v63  ;;  %v2013_v1 = vpop.f32.mrb[18].mxu0 }
 0x79f   : > { %v1243_v2 = vpop.f32.mrb[19].mxu0  ;;  %v1262_v7 = vmul.f32 0.17677669, %v2013_v1  ;;  %v1282_v8 = vsel %vm1263_vm8, %v1261_v3, -inf }
 0x7a0   : > { %v1260_v4 = vmul.f32 0.17677669, %v1243_v2  ;;  %v1276_v6 = vsel %vm1263_vm8, %v1259_v0, -inf }
 0x7a1   : > { %1274 = vmax.xlane.f32.xlu1 %v1273_v5  ;;  %1277 = vmax.xlane.f32.xlu0 %v1276_v6  ;;  %v1285_v10 = vsel %vm1263_vm8, %v1262_v7, -inf }
 0x7a2   : > { %v1279_v9 = vsel %vm1263_vm8, %v1260_v4, -inf }
 0x7a5   : > { %1283 = vmax.xlane.f32.xlu0 %v1282_v8  ;;  %1280 = vmax.xlane.f32.xlu1 %v1279_v9 }
 0x7a9   : > { %1286 = vmax.xlane.f32.xlu1 %v1285_v10 }
 0x825   : > { %v1272_v11 = vpop.xlane.xlu0 %1271 }
 0x826   : > { %v1290_v12 = vsub.f32 %v1257_v52, %v1272_v11  ;;  %v1266_v13 = vpop.xlane.xlu1 %1265  ;;  %v1458_v52 = vld [vmem:[#allocation7 + $0x8] sm:$0xff] }
 0x827   : > { %v1288_v14 = vsub.f32 %v1255_v54, %v1266_v13  ;;  %v1465_v54 = vpack.c.bf16 %v1458_v52, %v1457_v51 }
 0x828   : > { %v1300_v15 = vmul.f32 1.442695, %v1290_v12 }
 0x829   : > { %v1296_v16 = vmul.f32 1.442695, %v1288_v14  ;;  %2024 = vmatprep.subr.bf16.mxu0 %v1465_v54 }
 0x82a   : > { %v1269_v17 = vpop.xlane.xlu1 %1268  ;;  %2025 = vmatpush3.bf16.msra.mxu0 %v1465_v54 }
 0x82b   : > { %2119 = vpow2.f32 %v1296_v16  ;;  %v1289_v18 = vsub.f32 %v1256_v58, %v1269_v17  ;;  %2026 = vmatprep.subr.bf16.mxu0 %v1466_v56 }
 0x82c   : > { %2121 = vpow2.f32 %v1300_v15 }
 0x82d   : > { %v1298_v19 = vmul.f32 1.442695, %v1289_v18 }
 0x82e   : > { %v1275_v20 = vpop.xlane.xlu1 %1274  ;;  %v1278_v21 = vpop.xlane.xlu0 %1277  ;;  %2027 = vmatpush3.bf16.msra.mxu0 %v1466_v56 }
 0x82f   : > { %2123 = vpow2.f32 %v1298_v19  ;;  %v1291_v22 = vsub.f32 %v1258_v60, %v1275_v20  ;;  %v1292_v23 = vsub.f32 %v1259_v0, %v1278_v21 }
 0x831   : > { %v1302_v24 = vmul.f32 1.442695, %v1291_v22  ;;  %v1304_v25 = vmul.f32 1.442695, %v1292_v23 }
 0x832   : > { %v1284_v26 = vpop.xlane.xlu0 %1283  ;;  %v1281_v27 = vpop.xlane.xlu1 %1280 }
 0x833   : > { %2125 = vpow2.f32 %v1302_v24  ;;  %v1294_v28 = vsub.f32 %v1261_v3, %v1284_v26  ;;  %v1293_v29 = vsub.f32 %v1260_v4, %v1281_v27 }
 0x834   : > { %2127 = vpow2.f32 %v1304_v25 }
 0x835   : > { %v2120_v30 = vpop.eup %2119  ;;  %v1308_v31 = vmul.f32 1.442695, %v1294_v28  ;;  %v1306_v32 = vmul.f32 1.442695, %v1293_v29 }
 0x836   : > { %v1287_v34 = vpop.xlane.xlu1 %1286  ;;  %v1312_v35 = vsel %vm1263_vm8, %v2120_v30, 0.0  ;;  %v2122_v36 = vpop.eup %2121 }
 0x837   : > { %2129 = vpow2.f32 %v1308_v31  ;;  %v1295_v37 = vsub.f32 %v1262_v7, %v1287_v34  ;;  %1313 = vadd.xlane.f32.xlu0 %v1312_v35  ;;  %v1318_v39 = vsel %vm1263_vm8, %v2122_v36, 0.0  ;;  %v1853_v34 = vld [vmem:[%s2437_s17 + $0x8] sm:$0xff]   ;;  %v1835_v35 = vld [vmem:[%s2437_s17] sm:$0xff]  }
 0x838   : > { %2131 = vpow2.f32 %v1306_v32 }
 0x839   : > { %v2124_v38 = vpop.eup %2123  ;;  %v1310_v33 = vmul.f32 1.442695, %v1295_v37  ;;  %v1836_v37 = vunpack.c.l.bf16 %v1835_v35 }
 0x83a   : > { %v1315_v40 = vsel %vm1263_vm8, %v2124_v38, 0.0 }
 0x83b   : > { %2133 = vpow2.f32 %v1310_v33  ;;  %1319 = vadd.xlane.f32.xlu0 %v1318_v39  ;;  %1316 = vadd.xlane.f32.xlu1 %v1315_v40  ;;  %v1837_v39 = vunpack.c.h.bf16 %v1835_v35 }
 0x83d   : > { %v2126_v41 = vpop.eup %2125 }
 0x83e   : > { %v2128_v42 = vpop.eup %2127  ;;  %v1321_v43 = vsel %vm1263_vm8, %v2126_v41, 0.0 }
 0x83f   : > { %v1324_v44 = vsel %vm1263_vm8, %v2128_v42, 0.0  ;;  %1322 = vadd.xlane.f32.xlu1 %v1321_v43 }
 0x840   : > { %1325 = vadd.xlane.f32.xlu0 %v1324_v44 }
 0x841   : > { %v2130_v45 = vpop.eup %2129 }
 0x842   : > { %v2132_v46 = vpop.eup %2131  ;;  %v1330_v47 = vsel %vm1263_vm8, %v2130_v45, 0.0 }
 0x843   : > { %v1327_v48 = vsel %vm1263_vm8, %v2132_v46, 0.0 }
 0x844   : > { %1331 = vadd.xlane.f32.xlu0 %v1330_v47  ;;  %1328 = vadd.xlane.f32.xlu1 %v1327_v48  ;;  %v1855_v47 = vld [vmem:[%s2437_s17 + $0x18] sm:$0xff]  }
 0x845   : > { %v2134_v49 = vpop.eup %2133  ;;  %v1848_v53 = vunpack.c.l.bf16 %v1855_v47  ;;  %v1849_v55 = vunpack.c.h.bf16 %v1855_v47 }
 0x846   : > { %v1333_v50 = vsel %vm1263_vm8, %v2134_v49, 0.0 }
 0x848   : > { %1334 = vadd.xlane.f32.xlu1 %v1333_v50  ;;  %v1854_v50 = vld [vmem:[%s2437_s17 + $0x10] sm:$0xff]  }
 0x849   : > { %v1844_v54 = vunpack.c.l.bf16 %v1854_v50 }
 0x8c4   : > { %v1314_v57 = vpop.xlane.xlu0 %1313 }
 0x8c5   : > { %2135 = vrcp.f32 %v1314_v57  ;;  %v1845_v57 = vunpack.c.h.bf16 %v1854_v50 }
 0x8c8   : > { %v1320_v58 = vpop.xlane.xlu0 %1319  ;;  %v1317_v59 = vpop.xlane.xlu1 %1316 }
 0x8c9   : > { %2137 = vrcp.f32 %v1317_v59 }
 0x8ca   : > { %2139 = vrcp.f32 %v1320_v58 }
 0x8cc   : > { %v1323_v60 = vpop.xlane.xlu1 %1322 }
 0x8cd   : > { %v1326_v61 = vpop.xlane.xlu0 %1325  ;;  %2141 = vrcp.f32 %v1323_v60 }
 0x8ce   : > { %2143 = vrcp.f32 %v1326_v61 }
 0x8cf   : > { %v2136_v0 = vpop.eup %2135 }
 0x8d0   : > { %v1344_v4 = vmul.f32 %v2136_v0, %v2120_v30 }
 0x8d1   : > { %v1332_v62 = vpop.xlane.xlu0 %1331  ;;  %v1329_v63 = vpop.xlane.xlu1 %1328 }
 0x8d2   : > { %2145 = vrcp.f32 %v1329_v63 }
 0x8d3   : > { %v2138_v1 = vpop.eup %2137  ;;  %2147 = vrcp.f32 %v1332_v62 }
 0x8d4   : > { %v2140_v2 = vpop.eup %2139  ;;  %v1345_v5 = vmul.f32 %v2138_v1, %v2124_v38  ;;  %v1841_v38 = vunpack.c.h.bf16 %v1853_v34 }
 0x8d5   : > { %v1335_v3 = vpop.xlane.xlu1 %1334  ;;  %v1346_v8 = vmul.f32 %v2140_v2, %v2122_v36  ;;  %v1840_v36 = vunpack.c.l.bf16 %v1853_v34 }
 0x8d6   : > { %2149 = vrcp.f32 %v1335_v3  ;;  %v1368_v7 = vpack.c.bf16 %v1345_v5, %v1344_v4 }
 0x8d7   : > { %v2142_v6 = vpop.eup %2141 }
 0x8d8   : > { %v1347_v9 = vmul.f32 %v2142_v6, %v2126_v41  ;;  %2016 = vmatprep.mubr.msk.bf16.mxu1 %vm1263_vm8, %v1368_v7  ;;  %v2144_v11 = vpop.eup %2143 }
 0x8d9   : > { %v1348_v14 = vmul.f32 %v2144_v11, %v2128_v42 }
 0x8da   : > { %v1369_v10 = vpack.c.bf16 %v1347_v9, %v1346_v8 }
 0x8dc   : > { %2017 = vmatmul.mubr.msk.bf16.vlgmr.msra.gmra.mrb[12].mxu1 %vm1263_vm8, %v1369_v10  ;;  %v2146_v12 = vpop.eup %2145 }
 0x8dd   : > { %v2148_v13 = vpop.eup %2147  ;;  %v1349_v15 = vmul.f32 %v2146_v12, %v2132_v46 }
 0x8de   : > { %v1350_v18 = vmul.f32 %v2148_v13, %v2130_v45 }
 0x8df   : > { %v1370_v17 = vpack.c.bf16 %v1349_v15, %v1348_v14 }
 0x8e0   : > { %v2150_v16 = vpop.eup %2149 }
 0x8e1   : > { %v1351_v19 = vmul.f32 %v2150_v16, %v2134_v49  ;;  %2020 = vmatprep.mubr.msk.bf16.mxu1 %vm1263_vm8, %v1370_v17 }
 0x8e3   : > { %v1371_v20 = vpack.c.bf16 %v1351_v19, %v1350_v18 }
 0x8e5   : > { %2021 = vmatmul.mubr.msk.bf16.gmra.mrb[16].mxu1 %vm1263_vm8, %v1371_v20 }
 0x9af   : > { %v2018_v21 = vpop.f32.mrb[12].mxu1 }
 0x9b0   : > { %v1426_v22 = vpop.f32.mrb[13].mxu1 }
 0x9b1   : > { %v2019_v23 = vpop.f32.mrb[14].mxu1 }
 0x9b2   : > { %v1462_v24 = vpack.c.bf16 %v2019_v23, %v2018_v21  ;;  %v1429_v25 = vpop.f32.mrb[15].mxu1 }
 0x9b3   : > { %v1461_v26 = vpack.c.bf16 %v1429_v25, %v1426_v22 }
 0x9b5   : > { %2028 = vmatprep.mubr.msk.bf16.mxu0 %vm857_vm2, %v1461_v26 }
 0x9b6   : > { %2029 = vmatmul.mubr.msk.bf16.vlgmr.msra.gmra.mrb[20].mxu0 %vm857_vm2, %v1462_v24 }
 0x9b8   : > { %v2022_v27 = vpop.f32.mrb[16].mxu1 }
 0x9b9   : > { %v1442_v28 = vpop.f32.mrb[17].mxu1 }
 0x9ba   : > { %v2023_v29 = vpop.f32.mrb[18].mxu1 }
 0x9bb   : > { %v1464_v30 = vpack.c.bf16 %v2023_v29, %v2022_v27  ;;  %v1445_v31 = vpop.f32.mrb[19].mxu1 }
 0x9bc   : > { %v1463_v32 = vpack.c.bf16 %v1445_v31, %v1442_v28 }
 0x9be   : > { %2032 = vmatprep.mubr.msk.bf16.mxu0 %vm857_vm2, %v1463_v32 }
 0x9bf   : > { %2033 = vmatmul.mubr.msk.bf16.gmra.mrb[24].mxu0 %vm857_vm2, %v1464_v30 }
 0xa89   : > { %v2030_v33 = vpop.f32.mrb[20].mxu0 }
 0xa8a   : > { %v1546_v40 = vadd.f32 %v2030_v33, %v1840_v36  ;;  %v1513_v41 = vpop.f32.mrb[21].mxu0 }
 0xa8b   : > { %v1544_v42 = vadd.f32 %v1836_v37, %v1513_v41  ;;  %v2031_v43 = vpop.f32.mrb[22].mxu0 }
 0xa8c   : > { %v1812_v44 = vpack.c.bf16 %v1546_v40, %v1546_v40  ;;  %v1547_v45 = vadd.f32 %v2031_v43, %v1841_v38  ;;  %v1516_v46 = vpop.f32.mrb[23].mxu0 }
 0xa8d   : > { %v1810_v48 = vpack.c.bf16 %v1544_v42, %v1544_v42  ;;  %v1545_v49 = vadd.f32 %v1837_v39, %v1516_v46 }
 0xa8e   : > { %1589 = vst.msk [vmem:[%s2452_s22 + $0x8] sm:$0xf] %vm1586_vm9, %v1812_v44  ;;  %v1813_v51 = vpack.c.bf16 %v1547_v45, %v1547_v45 }
 0xa8f   : > { %1587 = vst.msk [vmem:[%s2452_s22] sm:$0xf] %vm1586_vm9, %v1810_v48  ;;  %v1811_v52 = vpack.c.bf16 %v1545_v49, %v1545_v49 }
 0xa90   : > { %1590 = vst.msk [vmem:[%s2452_s22 + $0xc] sm:$0xf] %vm1586_vm9, %v1813_v51 }
 0xa91   : > { %1588 = vst.msk [vmem:[%s2452_s22 + $0x4] sm:$0xf] %vm1586_vm9, %v1811_v52 }
 0xa92   : > { %v2034_v56 = vpop.f32.mrb[24].mxu0 }
 0xa93   : > { %v1550_v58 = vadd.f32 %v2034_v56, %v1848_v53  ;;  %v1529_v59 = vpop.f32.mrb[25].mxu0 }
 0xa94   : > { %v1548_v60 = vadd.f32 %v1844_v54, %v1529_v59  ;;  %v2035_v61 = vpop.f32.mrb[26].mxu0 }
 0xa95   : > { %v1816_v62 = vpack.c.bf16 %v1550_v58, %v1550_v58  ;;  %v1551_v63 = vadd.f32 %v2035_v61, %v1849_v55  ;;  %v1532_v0 = vpop.f32.mrb[27].mxu0 }
 0xa96   : > { %v1814_v1 = vpack.c.bf16 %v1548_v60, %v1548_v60  ;;  %v1549_v2 = vadd.f32 %v1845_v57, %v1532_v0 }
 0xa97   : > { %1593 = vst.msk [vmem:[%s2452_s22 + $0x18] sm:$0xf] %vm1586_vm9, %v1816_v62  ;;  %v1817_v3 = vpack.c.bf16 %v1551_v63, %v1551_v63 }
 0xa98   : > { %1591 = vst.msk [vmem:[%s2452_s22 + $0x10] sm:$0xf] %vm1586_vm9, %v1814_v1  ;;  %v1815_v4 = vpack.c.bf16 %v1549_v2, %v1549_v2 }
 0xa99   : > { %1594 = vst.msk [vmem:[%s2452_s22 + $0x1c] sm:$0xf] %vm1586_vm9, %v1817_v3 }
 0xa9a   : > { %1592 = vst.msk [vmem:[%s2452_s22 + $0x14] sm:$0xf] %vm1586_vm9, %v1815_v4 }
 0xa9b PF: > { %s2724_s17 = sld [smem:[#allocation13_spill]]  ;;  %s2725_s21 = sld [smem:[#allocation11_spill]] }
 0xa9c   : > { %s2726_s22 = sld [smem:[#allocation12_spill]]  ;;  %s2727_s23 = sld [smem:[#allocation14_spill]] }
 0xa9d   : > { %s2728_s24 = sld [smem:[#allocation15_spill]] }
 0xaa1   : > { %s25_s25 = sadd.s32 1, %s2724_s17  }
 0xaa2   : > { %p22_p10 = scmp.ge.s32.totalorder %s25_s25, 10  }
 0xaa4   :  { %24 = sbr.rel (!%p22_p10) target bundleno = 6 (0x6), region = 122 }
 0xaab   :  { %1642 = vsyncpa [#allocation6], 1 }
 0xaac   :  { %1644 = vsyncpa [#allocation6 + $0x1], 1 }
 0xaad   :  { %1645 = vsyncpa [#allocation8], 1 }

</bundles_post_ra>
